<compile_context>
chip_gen: v7x
topology: tpu7x:2x2x1
jax: 0.10.0
libtpu: 0.0.40
codegen_flags: <defaults>
</compile_context>

<pallas_src>
import functools

import jax
import jax.numpy as jnp
from jax.experimental import pallas as pl
from jax.experimental.pallas import tpu as pltpu

NUM_FEATURES = 128
ARCH = (500, 400, 300)


def _round_up(x, m):
    return (x + m - 1) // m * m


def actor_kernel(feat_ref, part_ref,
                 w1_ref, b1_ref, w2_ref, b2_ref,
                 w0a_ref, w0b_ref, b0_ref,
                 wl1_ref, bl1_ref, wl2_ref, bl2_ref,
                 wl3_ref, bl3_ref,
                 out_ref):
    feat = feat_ref[...]                                     # (TB, F0)    bf16
    part = part_ref[...]                                     # (TB*N, P)   bf16 (pre-flattened)
    tb = feat.shape[0]
    n = part.shape[0] // tb                                  # particles per batch row

    # conv1: Conv2d(1, 2F, kernel=(1, P)) == per-particle linear, ReLU
    h = jnp.dot(part, w1_ref[...], preferred_element_type=jnp.float32)
    h = jnp.maximum(h + b1_ref[...], 0.0)                    # (TB*N, 2F)  f32

    # conv2: Conv1d(2F, F, kernel=1) == per-particle linear, ReLU
    h = jnp.dot(h.astype(jnp.bfloat16), w2_ref[...],
                preferred_element_type=jnp.float32)
    h = jnp.maximum(h + b2_ref[...], 0.0)                    # (TB*N, F)   f32

    # AvgPool over the particle axis (post-pool ReLU is a no-op: h >= 0 already).
    # For N a multiple of 8 this reshape is (8,128)-tile aligned (no relayout).
    pooled = jnp.mean(h.reshape(tb, n, h.shape[-1]), axis=1)  # (TB, F)    f32

    # Linear 0 on concat([pooled, feat]) via split weights, ReLU.
    x = (jnp.dot(pooled.astype(jnp.bfloat16), w0a_ref[...],
                 preferred_element_type=jnp.float32)
         + jnp.dot(feat, w0b_ref[...], preferred_element_type=jnp.float32)
         + b0_ref[...])
    x = jnp.maximum(x, 0.0)                                   # (TB, 512)

    x = jnp.maximum(jnp.dot(x.astype(jnp.bfloat16), wl1_ref[...],
                            preferred_element_type=jnp.float32) + bl1_ref[...], 0.0)
    x = jnp.maximum(jnp.dot(x.astype(jnp.bfloat16), wl2_ref[...],
                            preferred_element_type=jnp.float32) + bl2_ref[...], 0.0)
    x = jnp.dot(x.astype(jnp.bfloat16), wl3_ref[...],
                preferred_element_type=jnp.float32) + bl3_ref[...]
    out_ref[...] = jnp.tanh(x)                                # (TB, A_pad) f32


def init_params(key, P, F0, A, num_features=NUM_FEATURES, arch=ARCH):
    """PyTorch-style uniform(-1/sqrt(fan_in), 1/sqrt(fan_in)) init.

    Weights are stored pre-transposed as (in, out) so the kernel does x @ W.
    Biases are stored as (1, dim).  Everything f32; the wrapper handles casting."""
    keys = jax.random.split(key, 13)

    def u(k, shape, fan_in):
        bound = 1.0 / float(fan_in) ** 0.5
        return jax.random.uniform(k, shape, jnp.float32, -bound, bound)

    F2 = 2 * num_features
    fan0 = num_features + F0
    return {
        'w1':  u(keys[0],  (P, F2), P),
        'b1':  u(keys[1],  (1, F2), P),
        'w2':  u(keys[2],  (F2, num_features), F2),
        'b2':  u(keys[3],  (1, num_features), F2),
        'w0a': u(keys[4],  (num_features, arch[0]), fan0),
        'w0b': u(keys[5],  (F0, arch[0]), fan0),
        'b0':  u(keys[6],  (1, arch[0]), fan0),
        'wl1': u(keys[7],  (arch[0], arch[1]), arch[0]),
        'bl1': u(keys[8],  (1, arch[1]), arch[0]),
        'wl2': u(keys[9],  (arch[1], arch[2]), arch[1]),
        'bl2': u(keys[10], (1, arch[2]), arch[1]),
        'wl3': u(keys[11], (arch[2], A), arch[2]),
        'bl3': u(keys[12], (1, A), arch[2]),
    }


@functools.partial(jax.jit, static_argnames=('block_b',))
def actor_forward(state_features, state_particles, params, block_b=256):
    B, F0 = state_features.shape
    _, N, P = state_particles.shape
    F = params['w2'].shape[1]
    H0 = params['w0a'].shape[1]
    H1 = params['wl1'].shape[1]
    H2 = params['wl2'].shape[1]
    A = params['wl3'].shape[1]

    # Lane-padded layer widths (numerically exact: zero cols/rows/bias entries).
    h0p = _round_up(H0, 128)          # 500 -> 512
    h1p = _round_up(H1, 128)          # 400 -> 512
    h2p = _round_up(H2, 128)          # 300 -> 384
    a_pad = _round_up(max(A, 1), 128)  # A   -> 128

    # Batch tile: >=2 grid steps when B allows (v7x dual-TC sharding), tb a
    # multiple of 16 (bf16 sublane pack), minimal padded rows.
    n_tiles = max(pl.cdiv(B, block_b), 2)
    tb = _round_up(pl.cdiv(B, n_tiles), 16)
    n_tiles = pl.cdiv(B, tb)
    b_pad = n_tiles * tb

    # Inputs -> bf16 (MXU operands); pad batch up to a whole number of tiles and
    # flatten the particle tensor to (B*N, P) OUTSIDE the kernel (layout plumbing).
    feat = state_features.astype(jnp.bfloat16)
    part = state_particles.astype(jnp.bfloat16)
    if b_pad != B:
        feat = jnp.pad(feat, ((0, b_pad - B), (0, 0)))
        part = jnp.pad(part, ((0, b_pad - B), (0, 0), (0, 0)))
    part = part.reshape(b_pad * N, P)

    # Weights -> bf16 (biases stay f32), zero-padded to lane-dense widths.
    bf16 = lambda w: w.astype(jnp.bfloat16)
    padc = lambda w, c: jnp.pad(w, ((0, 0), (0, c - w.shape[1])))
    padrc = lambda w, r, c: jnp.pad(w, ((0, r - w.shape[0]), (0, c - w.shape[1])))

    weights = [
        bf16(params['w1']),  params['b1'],
        bf16(params['w2']),  params['b2'],
        bf16(padc(params['w0a'], h0p)), bf16(padc(params['w0b'], h0p)), padc(params['b0'], h0p),
        bf16(padrc(params['wl1'], h0p, h1p)), padc(params['bl1'], h1p),
        bf16(padrc(params['wl2'], h1p, h2p)), padc(params['bl2'], h2p),
        bf16(padrc(params['wl3'], h2p, a_pad)), padc(params['bl3'], a_pad),
    ]

    def resident(arr):  # weights: same block every grid step -> stay VMEM-resident
        return pl.BlockSpec(arr.shape, lambda i: (0, 0))

    in_specs = ([pl.BlockSpec((tb, F0), lambda i: (i, 0)),
                 pl.BlockSpec((tb * N, P), lambda i: (i, 0))]
                + [resident(w) for w in weights])
    out_spec = pl.BlockSpec((tb, a_pad), lambda i: (i, 0))

    out = pl.pallas_call(
        actor_kernel,
        out_shape=jax.ShapeDtypeStruct((b_pad, a_pad), jnp.float32),
        grid_spec=pltpu.PrefetchScalarGridSpec(
            num_scalar_prefetch=0,
            grid=(n_tiles,),
            in_specs=in_specs,
            out_specs=out_spec),
        compiler_params=pltpu.CompilerParams(
            dimension_semantics=("parallel",),
            vmem_limit_bytes=32 * 1024 * 1024),
    )(feat, part, *weights)
    return out[:B, :A]


def actor_reference(state_features, state_particles, params):
    """Pure-JAX f32 reference of the PyTorch forward (norm=None)."""
    h = jnp.einsum('bnp,pc->bnc', state_particles, params['w1']) + params['b1'][:, None, :]
    h = jnp.maximum(h, 0.0)
    h = jnp.einsum('bnc,cd->bnd', h, params['w2']) + params['b2'][:, None, :]
    h = jnp.maximum(h, 0.0)
    pooled = jnp.maximum(jnp.mean(h, axis=1), 0.0)
    x = pooled @ params['w0a'] + state_features @ params['w0b'] + params['b0']
    x = jnp.maximum(x, 0.0)
    x = jnp.maximum(x @ params['wl1'] + params['bl1'], 0.0)
    x = jnp.maximum(x @ params['wl2'] + params['bl2'], 0.0)
    return jnp.tanh(x @ params['wl3'] + params['bl3'])


# TODO(synk): norm='layer' / 'weight_normalization' branches of the module are not
# implemented; this kernel covers the default norm=None path only.
# TODO(synk): if tighter-than-bf16 accuracy is required, keep w1/w2 and wl3 in f32
# (their HBM/VMEM cost is negligible).

if __name__ == "__main__":
    key = jax.random.PRNGKey(0)
    kf, kp, kparam = jax.random.split(key, 3)

    # Small shapes implied by the module:
    #   obs_space[0].shape = (F0,), obs_space[1].shape = (N, P), action dim A.
    B, N, P, F0, A = 2, 8, 4, 6, 3

    state_features = jax.random.normal(kf, (B, F0), jnp.float32)
    state_particles = jax.random.normal(kp, (B, N, P), jnp.float32)
    params = init_params(kparam, P, F0, A)

    out = jax.block_until_ready(actor_forward(state_features, state_particles, params))

    assert out.shape == (B, A), out.shape
    assert bool(jnp.all(jnp.isfinite(out)))
    assert bool(jnp.all(jnp.abs(out) <= 1.0))  # tanh output

    # Loose check vs f32 reference (kernel uses bf16 weights/activations at MXU inputs).
    ref = actor_reference(state_features, state_particles, params)
    assert float(jnp.max(jnp.abs(out - ref))) < 0.25

    print("KERNEL_OK")
</pallas_src>

<mosaic_0001>
module attributes {stable_mosaic.version = 11 : i64} {
  func.func @actor_kernel(%arg0: i32, %arg1: memref<16x6xbf16, #tpu.memory_space<vmem>>, %arg2: memref<128x4xbf16, #tpu.memory_space<vmem>>, %arg3: memref<4x256xbf16, #tpu.memory_space<vmem>>, %arg4: memref<1x256xf32, #tpu.memory_space<vmem>>, %arg5: memref<256x128xbf16, #tpu.memory_space<vmem>>, %arg6: memref<1x128xf32, #tpu.memory_space<vmem>>, %arg7: memref<128x512xbf16, #tpu.memory_space<vmem>>, %arg8: memref<6x512xbf16, #tpu.memory_space<vmem>>, %arg9: memref<1x512xf32, #tpu.memory_space<vmem>>, %arg10: memref<512x512xbf16, #tpu.memory_space<vmem>>, %arg11: memref<1x512xf32, #tpu.memory_space<vmem>>, %arg12: memref<512x384xbf16, #tpu.memory_space<vmem>>, %arg13: memref<1x384xf32, #tpu.memory_space<vmem>>, %arg14: memref<384x128xbf16, #tpu.memory_space<vmem>>, %arg15: memref<1x128xf32, #tpu.memory_space<vmem>>, %arg16: memref<16x128xf32, #tpu.memory_space<vmem>>) attributes {dimension_semantics = [#tpu.dimension_semantics<parallel>], iteration_bounds = array<i64: 1>, scalar_prefetch = 0 : i64, scratch_operands = 0 : i64, tpu.core_type = #tpu.core_type<tc>, window_params = [{transform_indices = @transform_0, window_bounds = array<i64: 16, 6>}, {transform_indices = @transform_1, window_bounds = array<i64: 128, 4>}, {pipeline_mode = #tpu.pipeline_mode<synchronous>, transform_indices = @transform_2, window_bounds = array<i64: 4, 256>}, {pipeline_mode = #tpu.pipeline_mode<synchronous>, transform_indices = @transform_3, window_bounds = array<i64: 1, 256>}, {pipeline_mode = #tpu.pipeline_mode<synchronous>, transform_indices = @transform_4, window_bounds = array<i64: 256, 128>}, {pipeline_mode = #tpu.pipeline_mode<synchronous>, transform_indices = @transform_5, window_bounds = array<i64: 1, 128>}, {pipeline_mode = #tpu.pipeline_mode<synchronous>, transform_indices = @transform_6, window_bounds = array<i64: 128, 512>}, {pipeline_mode = #tpu.pipeline_mode<synchronous>, transform_indices = @transform_7, window_bounds = array<i64: 6, 512>}, {pipeline_mode = #tpu.pipeline_mode<synchronous>, transform_indices = @transform_8, window_bounds = array<i64: 1, 512>}, {pipeline_mode = #tpu.pipeline_mode<synchronous>, transform_indices = @transform_9, window_bounds = array<i64: 512, 512>}, {pipeline_mode = #tpu.pipeline_mode<synchronous>, transform_indices = @transform_10, window_bounds = array<i64: 1, 512>}, {pipeline_mode = #tpu.pipeline_mode<synchronous>, transform_indices = @transform_11, window_bounds = array<i64: 512, 384>}, {pipeline_mode = #tpu.pipeline_mode<synchronous>, transform_indices = @transform_12, window_bounds = array<i64: 1, 384>}, {pipeline_mode = #tpu.pipeline_mode<synchronous>, transform_indices = @transform_13, window_bounds = array<i64: 384, 128>}, {pipeline_mode = #tpu.pipeline_mode<synchronous>, transform_indices = @transform_14, window_bounds = array<i64: 1, 128>}, {transform_indices = @transform_15, window_bounds = array<i64: 16, 128>}]} {
    %c0 = arith.constant 0 : index
    %c0_0 = arith.constant 0 : index
    %0 = vector.load %arg1[%c0, %c0_0] : memref<16x6xbf16, #tpu.memory_space<vmem>>, vector<16x6xbf16>
    %c0_1 = arith.constant 0 : index
    %c0_2 = arith.constant 0 : index
    %1 = vector.load %arg2[%c0_1, %c0_2] : memref<128x4xbf16, #tpu.memory_space<vmem>>, vector<128x4xbf16>
    %c0_3 = arith.constant 0 : index
    %c0_4 = arith.constant 0 : index
    %2 = vector.load %arg3[%c0_3, %c0_4] : memref<4x256xbf16, #tpu.memory_space<vmem>>, vector<4x256xbf16>
    %cst = arith.constant dense<0.000000e+00> : vector<128x256xf32>
    %3 = tpu.matmul %1, %2, %cst {dimension_numbers = #tpu.dot_dimension_numbers<[1], [0], [0], [1], [0, 0, 1, 1], [], []>} : vector<128x4xbf16>, vector<4x256xbf16>, vector<128x256xf32> -> vector<128x256xf32>
    %c0_5 = arith.constant 0 : index
    %c0_6 = arith.constant 0 : index
    %4 = vector.load %arg4[%c0_5, %c0_6] : memref<1x256xf32, #tpu.memory_space<vmem>>, vector<1x256xf32>
    %5 = vector.broadcast %4 : vector<1x256xf32> to vector<128x256xf32>
    %6 = arith.addf %3, %5 : vector<128x256xf32>
    %cst_7 = arith.constant 0.000000e+00 : f32
    %7 = vector.broadcast %cst_7 : f32 to vector<128x256xf32>
    %8 = arith.maximumf %6, %7 : vector<128x256xf32>
    %9 = arith.truncf %8 : vector<128x256xf32> to vector<128x256xbf16>
    %c0_8 = arith.constant 0 : index
    %c0_9 = arith.constant 0 : index
    %10 = vector.load %arg5[%c0_8, %c0_9] : memref<256x128xbf16, #tpu.memory_space<vmem>>, vector<256x128xbf16>
    %cst_10 = arith.constant dense<0.000000e+00> : vector<128x128xf32>
    %11 = tpu.matmul %9, %10, %cst_10 {dimension_numbers = #tpu.dot_dimension_numbers<[1], [0], [0], [1], [0, 0, 1, 1], [], []>} : vector<128x256xbf16>, vector<256x128xbf16>, vector<128x128xf32> -> vector<128x128xf32>
    %c0_11 = arith.constant 0 : index
    %c0_12 = arith.constant 0 : index
    %12 = vector.load %arg6[%c0_11, %c0_12] : memref<1x128xf32, #tpu.memory_space<vmem>>, vector<1x128xf32>
    %13 = vector.broadcast %12 : vector<1x128xf32> to vector<128x128xf32>
    %14 = arith.addf %11, %13 : vector<128x128xf32>
    %cst_13 = arith.constant 0.000000e+00 : f32
    %15 = vector.broadcast %cst_13 : f32 to vector<128x128xf32>
    %16 = arith.maximumf %14, %15 : vector<128x128xf32>
    %17 = vector.shape_cast %16 : vector<128x128xf32> to vector<16x8x128xf32>
    %cst_14 = arith.constant dense<0.000000e+00> : vector<16x128xf32>
    %18 = vector.multi_reduction <add>, %17, %cst_14 [1] : vector<16x8x128xf32> to vector<16x128xf32>
    %cst_15 = arith.constant 8.000000e+00 : f32
    %19 = vector.broadcast %cst_15 : f32 to vector<16x128xf32>
    %20 = arith.divf %18, %19 : vector<16x128xf32>
    %21 = arith.truncf %20 : vector<16x128xf32> to vector<16x128xbf16>
    %c0_16 = arith.constant 0 : index
    %c0_17 = arith.constant 0 : index
    %22 = vector.load %arg7[%c0_16, %c0_17] : memref<128x512xbf16, #tpu.memory_space<vmem>>, vector<128x512xbf16>
    %cst_18 = arith.constant dense<0.000000e+00> : vector<16x512xf32>
    %23 = tpu.matmul %21, %22, %cst_18 {dimension_numbers = #tpu.dot_dimension_numbers<[1], [0], [0], [1], [0, 0, 1, 1], [], []>} : vector<16x128xbf16>, vector<128x512xbf16>, vector<16x512xf32> -> vector<16x512xf32>
    %c0_19 = arith.constant 0 : index
    %c0_20 = arith.constant 0 : index
    %24 = vector.load %arg8[%c0_19, %c0_20] : memref<6x512xbf16, #tpu.memory_space<vmem>>, vector<6x512xbf16>
    %cst_21 = arith.constant dense<0.000000e+00> : vector<16x512xf32>
    %25 = tpu.matmul %0, %24, %cst_21 {dimension_numbers = #tpu.dot_dimension_numbers<[1], [0], [0], [1], [0, 0, 1, 1], [], []>} : vector<16x6xbf16>, vector<6x512xbf16>, vector<16x512xf32> -> vector<16x512xf32>
    %26 = arith.addf %23, %25 : vector<16x512xf32>
    %c0_22 = arith.constant 0 : index
    %c0_23 = arith.constant 0 : index
    %27 = vector.load %arg9[%c0_22, %c0_23] : memref<1x512xf32, #tpu.memory_space<vmem>>, vector<1x512xf32>
    %28 = vector.broadcast %27 : vector<1x512xf32> to vector<16x512xf32>
    %29 = arith.addf %26, %28 : vector<16x512xf32>
    %cst_24 = arith.constant 0.000000e+00 : f32
    %30 = vector.broadcast %cst_24 : f32 to vector<16x512xf32>
    %31 = arith.maximumf %29, %30 : vector<16x512xf32>
    %32 = arith.truncf %31 : vector<16x512xf32> to vector<16x512xbf16>
    %c0_25 = arith.constant 0 : index
    %c0_26 = arith.constant 0 : index
    %33 = vector.load %arg10[%c0_25, %c0_26] : memref<512x512xbf16, #tpu.memory_space<vmem>>, vector<512x512xbf16>
    %cst_27 = arith.constant dense<0.000000e+00> : vector<16x512xf32>
    %34 = tpu.matmul %32, %33, %cst_27 {dimension_numbers = #tpu.dot_dimension_numbers<[1], [0], [0], [1], [0, 0, 1, 1], [], []>} : vector<16x512xbf16>, vector<512x512xbf16>, vector<16x512xf32> -> vector<16x512xf32>
    %c0_28 = arith.constant 0 : index
    %c0_29 = arith.constant 0 : index
    %35 = vector.load %arg11[%c0_28, %c0_29] : memref<1x512xf32, #tpu.memory_space<vmem>>, vector<1x512xf32>
    %36 = vector.broadcast %35 : vector<1x512xf32> to vector<16x512xf32>
    %37 = arith.addf %34, %36 : vector<16x512xf32>
    %cst_30 = arith.constant 0.000000e+00 : f32
    %38 = vector.broadcast %cst_30 : f32 to vector<16x512xf32>
    %39 = arith.maximumf %37, %38 : vector<16x512xf32>
    %40 = arith.truncf %39 : vector<16x512xf32> to vector<16x512xbf16>
    %c0_31 = arith.constant 0 : index
    %c0_32 = arith.constant 0 : index
    %41 = vector.load %arg12[%c0_31, %c0_32] : memref<512x384xbf16, #tpu.memory_space<vmem>>, vector<512x384xbf16>
    %cst_33 = arith.constant dense<0.000000e+00> : vector<16x384xf32>
    %42 = tpu.matmul %40, %41, %cst_33 {dimension_numbers = #tpu.dot_dimension_numbers<[1], [0], [0], [1], [0, 0, 1, 1], [], []>} : vector<16x512xbf16>, vector<512x384xbf16>, vector<16x384xf32> -> vector<16x384xf32>
    %c0_34 = arith.constant 0 : index
    %c0_35 = arith.constant 0 : index
    %43 = vector.load %arg13[%c0_34, %c0_35] : memref<1x384xf32, #tpu.memory_space<vmem>>, vector<1x384xf32>
    %44 = vector.broadcast %43 : vector<1x384xf32> to vector<16x384xf32>
    %45 = arith.addf %42, %44 : vector<16x384xf32>
    %cst_36 = arith.constant 0.000000e+00 : f32
    %46 = vector.broadcast %cst_36 : f32 to vector<16x384xf32>
    %47 = arith.maximumf %45, %46 : vector<16x384xf32>
    %48 = arith.truncf %47 : vector<16x384xf32> to vector<16x384xbf16>
    %c0_37 = arith.constant 0 : index
    %c0_38 = arith.constant 0 : index
    %49 = vector.load %arg14[%c0_37, %c0_38] : memref<384x128xbf16, #tpu.memory_space<vmem>>, vector<384x128xbf16>
    %cst_39 = arith.constant dense<0.000000e+00> : vector<16x128xf32>
    %50 = tpu.matmul %48, %49, %cst_39 {dimension_numbers = #tpu.dot_dimension_numbers<[1], [0], [0], [1], [0, 0, 1, 1], [], []>} : vector<16x384xbf16>, vector<384x128xbf16>, vector<16x128xf32> -> vector<16x128xf32>
    %c0_40 = arith.constant 0 : index
    %c0_41 = arith.constant 0 : index
    %51 = vector.load %arg15[%c0_40, %c0_41] : memref<1x128xf32, #tpu.memory_space<vmem>>, vector<1x128xf32>
    %52 = vector.broadcast %51 : vector<1x128xf32> to vector<16x128xf32>
    %53 = arith.addf %50, %52 : vector<16x128xf32>
    %54 = math.tanh %53 : vector<16x128xf32>
    %c0_42 = arith.constant 0 : index
    %c0_43 = arith.constant 0 : index
    %55 = vector.load %arg16[%c0_42, %c0_43] : memref<16x128xf32, #tpu.memory_space<vmem>>, vector<16x128xf32>
    tpu.vector_store %arg16[%c0_42, %c0_43], %54 {strides = array<i32>} : memref<16x128xf32, #tpu.memory_space<vmem>>, vector<16x128xf32>,
    return
  }
  func.func @transform_0(%arg0: i32) -> (i32, i32) {
    %c0_i32 = arith.constant 0 : i32
    %c0_i32_0 = arith.constant 0 : i32
    return %arg0, %c0_i32 : i32, i32
  }
  func.func @transform_1(%arg0: i32) -> (i32, i32) {
    %c0_i32 = arith.constant 0 : i32
    %c0_i32_0 = arith.constant 0 : i32
    return %arg0, %c0_i32 : i32, i32
  }
  func.func @transform_2(%arg0: i32) -> (i32, i32) {
    %c0_i32 = arith.constant 0 : i32
    %c0_i32_0 = arith.constant 0 : i32
    %c0_i32_1 = arith.constant 0 : i32
    return %c0_i32, %c0_i32_0 : i32, i32
  }
  func.func @transform_3(%arg0: i32) -> (i32, i32) {
    %c0_i32 = arith.constant 0 : i32
    %c0_i32_0 = arith.constant 0 : i32
    %c0_i32_1 = arith.constant 0 : i32
    return %c0_i32, %c0_i32_0 : i32, i32
  }
  func.func @transform_4(%arg0: i32) -> (i32, i32) {
    %c0_i32 = arith.constant 0 : i32
    %c0_i32_0 = arith.constant 0 : i32
    %c0_i32_1 = arith.constant 0 : i32
    return %c0_i32, %c0_i32_0 : i32, i32
  }
  func.func @transform_5(%arg0: i32) -> (i32, i32) {
    %c0_i32 = arith.constant 0 : i32
    %c0_i32_0 = arith.constant 0 : i32
    %c0_i32_1 = arith.constant 0 : i32
    return %c0_i32, %c0_i32_0 : i32, i32
  }
  func.func @transform_6(%arg0: i32) -> (i32, i32) {
    %c0_i32 = arith.constant 0 : i32
    %c0_i32_0 = arith.constant 0 : i32
    %c0_i32_1 = arith.constant 0 : i32
    return %c0_i32, %c0_i32_0 : i32, i32
  }
  func.func @transform_7(%arg0: i32) -> (i32, i32) {
    %c0_i32 = arith.constant 0 : i32
    %c0_i32_0 = arith.constant 0 : i32
    %c0_i32_1 = arith.constant 0 : i32
    return %c0_i32, %c0_i32_0 : i32, i32
  }
  func.func @transform_8(%arg0: i32) -> (i32, i32) {
    %c0_i32 = arith.constant 0 : i32
    %c0_i32_0 = arith.constant 0 : i32
    %c0_i32_1 = arith.constant 0 : i32
    return %c0_i32, %c0_i32_0 : i32, i32
  }
  func.func @transform_9(%arg0: i32) -> (i32, i32) {
    %c0_i32 = arith.constant 0 : i32
    %c0_i32_0 = arith.constant 0 : i32
    %c0_i32_1 = arith.constant 0 : i32
    return %c0_i32, %c0_i32_0 : i32, i32
  }
  func.func @transform_10(%arg0: i32) -> (i32, i32) {
    %c0_i32 = arith.constant 0 : i32
    %c0_i32_0 = arith.constant 0 : i32
    %c0_i32_1 = arith.constant 0 : i32
    return %c0_i32, %c0_i32_0 : i32, i32
  }
  func.func @transform_11(%arg0: i32) -> (i32, i32) {
    %c0_i32 = arith.constant 0 : i32
    %c0_i32_0 = arith.constant 0 : i32
    %c0_i32_1 = arith.constant 0 : i32
    return %c0_i32, %c0_i32_0 : i32, i32
  }
  func.func @transform_12(%arg0: i32) -> (i32, i32) {
    %c0_i32 = arith.constant 0 : i32
    %c0_i32_0 = arith.constant 0 : i32
    %c0_i32_1 = arith.constant 0 : i32
    return %c0_i32, %c0_i32_0 : i32, i32
  }
  func.func @transform_13(%arg0: i32) -> (i32, i32) {
    %c0_i32 = arith.constant 0 : i32
    %c0_i32_0 = arith.constant 0 : i32
    %c0_i32_1 = arith.constant 0 : i32
    return %c0_i32, %c0_i32_0 : i32, i32
  }
  func.func @transform_14(%arg0: i32) -> (i32, i32) {
    %c0_i32 = arith.constant 0 : i32
    %c0_i32_0 = arith.constant 0 : i32
    %c0_i32_1 = arith.constant 0 : i32
    return %c0_i32, %c0_i32_0 : i32, i32
  }
  func.func @transform_15(%arg0: i32) -> (i32, i32) {
    %c0_i32 = arith.constant 0 : i32
    %c0_i32_0 = arith.constant 0 : i32
    return %arg0, %c0_i32 : i32, i32
  }
}

</mosaic_0001>

<bundles_post_ra>
// kernel: actor_forward.1
= control target key start
LH: loop header
LB: loop body
LE: loop exit
PB: predicated region body
PF: predicated region fallthrough
CT: control target
= control target key end

     0   :  { %vm156_vm0 = vcmask 1041408   ;;  %v4237_v1 = vmov 0   ;;  %vm131_vm1 = vcmask 31744   ;;  %vm754_vm2 = vcmask 1042432   ;;  %s5408_s2 = inlined_call_operand.vmem [shape: bf16[4,256], index: 2, kind: input, shape index: {}]   ;;  %s5409_s1 = inlined_call_operand.vmem [shape: bf16[128,4], index: 1, kind: input, shape index: {}]   ;;  %s5410_s4 = inlined_call_operand.vmem [shape: bf16[256,128], index: 4, kind: input, shape index: {}]   ;;  %s5411_s7 = inlined_call_operand.vmem [shape: bf16[6,512], index: 7, kind: input, shape index: {}]   ;;  %s5412_s3 = inlined_call_operand.vmem [shape: f32[1,256], index: 3, kind: input, shape index: {}]   ;;  %s5413_s0 = inlined_call_operand.vmem [shape: bf16[16,6], index: 0, kind: input, shape index: {}]   ;;  %s5414_s6 = inlined_call_operand.vmem [shape: bf16[128,512], index: 6, kind: input, shape index: {}]   ;;  %s5415_s9 = inlined_call_operand.vmem [shape: bf16[512,512], index: 9, kind: input, shape index: {}]   ;;  %s5416_s5 = inlined_call_operand.vmem [shape: f32[1,128], index: 5, kind: input, shape index: {}]   ;;  %s5417_s11 = inlined_call_operand.vmem [shape: bf16[512,384], index: 11, kind: input, shape index: {}]   ;;  %s5418_s8 = inlined_call_operand.vmem [shape: f32[1,512], index: 8, kind: input, shape index: {}]   ;;  %s5419_s10 = inlined_call_operand.vmem [shape: f32[1,512], index: 10, kind: input, shape index: {}]   ;;  %s5420_s13 = inlined_call_operand.vmem [shape: bf16[384,128], index: 13, kind: input, shape index: {}]   ;;  %s5421_s12 = inlined_call_operand.vmem [shape: f32[1,384], index: 12, kind: input, shape index: {}]   ;;  %s5422_s14 = inlined_call_operand.vmem [shape: f32[1,128], index: 14, kind: input, shape index: {}]   ;;  %s5423_s15 = inlined_call_operand.vmem [shape: f32[16,128], index: 15, kind: output, shape index: {}]  }
   0x1   :  { %v3301_v0 = vld.sshfl [vmem:[%s5408_s2] sm:$0x33 pattern:$0x76325410]  ;;  %195 = vmatprep.mubr.bf16.mxu0 %v4237_v1  ;;  %v3813_v5 = vld [vmem:[%s5409_s1 + $0x8] sm:$0xff]   ;;  %v3824_v10 = vld [vmem:[%s5410_s4 + $0x50] sm:$0xff]   ;;  %v72_v32 = vlaneseq }
   0x2   :  { %v130_v2 = vcombine.high %v3301_v0, %v3301_v0  ;;  %v158_v3 = vsel %vm156_vm0, %v3301_v0, 0  ;;  %v3812_v4 = vld [vmem:[%s5409_s1] sm:$0xff]   ;;  %v3822_v8 = vld [vmem:[%s5410_s4 + $0x48] sm:$0xff]   ;;  %v3825_v11 = vld [vmem:[%s5410_s4 + $0x10] sm:$0xff]   ;;  %vm750_vm3 = vcmask 48128   ;;  %vm885_vm4 = vcmask 1041409  }
   0x3   :  { %v3820_v6 = vld [vmem:[%s5410_s4 + $0x40] sm:$0xff]   ;;  %v3823_v9 = vld [vmem:[%s5410_s4 + $0x8] sm:$0xff]   ;;  %v3826_v12 = vld [vmem:[%s5410_s4 + $0x58] sm:$0xff]   ;;  %v4417_v33 = vshrl.u32 %v72_v32, 7  ;;  %vm887_vm5 = vcmask 1042434   ;;  %vm889_vm6 = vcmask 1043459  }
   0x4   :  { %3302 = vmatprep.subr.msk.bf16.mxu0 %vm156_vm0, %v130_v2  ;;  %v3821_v7 = vld [vmem:[%s5410_s4] sm:$0xff]   ;;  %3618 = vmatprep.subr.bf16.mxu1 %v3820_v6  ;;  %v3814_v13 = vld [vmem:[%s5409_s1 + $0x10] sm:$0xff]   ;;  %v3827_v14 = vld [vmem:[%s5410_s4 + $0x18] sm:$0xff]   ;;  %vm891_vm7 = vcmask 1044484   ;;  %vm893_vm8 = vcmask 1045509   ;;  %vm895_vm9 = vcmask 1046534  }
   0x5   :  { %164 = vmatpush1.bf16.msra.mxu0 %v158_v3  ;;  %3619 = vmatpush3.bf16.msra.mxu1 %v3821_v7  ;;  %v3828_v15 = vld [vmem:[%s5410_s4 + $0x60] sm:$0xff]   ;;  %v3830_v17 = vld [vmem:[%s5410_s4 + $0x68] sm:$0xff]   ;;  %v3815_v18 = vld [vmem:[%s5409_s1 + $0x18] sm:$0xff]   ;;  %v4420_v34 = vsub.s32 0, %v4417_v33  ;;  %v4426_v36 = vsub.s32 1, %v4417_v33  ;;  %vm897_vm10 = vcmask 1047559  }
   0x6   :  { %3620 = vmatprep.subr.bf16.mxu1 %v3822_v8  ;;  %v3829_v16 = vld [vmem:[%s5410_s4 + $0x20] sm:$0xff]   ;;  %v3817_v20 = vld [vmem:[%s5409_s1 + $0x28] sm:$0xff]   ;;  %v3818_v21 = vld [vmem:[%s5409_s1 + $0x30] sm:$0xff]   ;;  %vm4239_vm11 = vmmov 0  }
   0x7   :  { %v3816_v19 = vld [vmem:[%s5409_s1 + $0x20] sm:$0xff]   ;;  %v3819_v22 = vld [vmem:[%s5409_s1 + $0x38] sm:$0xff]   ;;  %v3831_v23 = vld [vmem:[%s5410_s4 + $0x28] sm:$0xff]  }
   0x8   :  { %3303 = vmatmul.mubr.msk.bf16.vlgmr.msra.gmra.mrb[0].mxu0 %vm131_vm1, %v3812_v4  ;;  %v3832_v24 = vld [vmem:[%s5410_s4 + $0x70] sm:$0xff]   ;;  %v3834_v26 = vld [vmem:[%s5410_s4 + $0x78] sm:$0xff]   ;;  %v733_v28 = vld [vmem:[%s5411_s7] sm:$0x77] }
   0x9   :  { %205 = vmatprep.mubr.bf16.mxu0 %v4237_v1  ;;  %3621 = vmatpush3.bf16.msra.mxu1 %v3823_v9  ;;  %v3833_v25 = vld [vmem:[%s5410_s4 + $0x30] sm:$0xff]   ;;  %v3835_v27 = vld [vmem:[%s5410_s4 + $0x38] sm:$0xff]   ;;  %v3330_v29 = vcombine.high %v733_v28, %v733_v28  ;;  %v3329_v30 = vcombine.low %v733_v28, %v733_v28  ;;  %v70_v35 = vld [vmem:[%s5412_s3] sm:$0x3] }
   0xa   :  { %3622 = vmatprep.subr.bf16.mxu1 %v3824_v10  ;;  %v4429_v37 = vrot.slane %v70_v35, %v4420_v34  ;;  %v4432_v38 = vrot.slane %v70_v35, %v4426_v36 }
   0xb   :  { %3333 = vmatprep.subr.msk.bf16.mxu0 %vm754_vm2, %v3330_v29  ;;  %v756_v31 = vsel %vm754_vm2, %v3329_v30, 0 }
   0xc   :  { %768 = vmatpush1.bf16.msra.mxu0 %v756_v31 }
   0xd   :  { %3623 = vmatpush3.bf16.msra.mxu1 %v3825_v11 }
   0xe   :  { %3624 = vmatprep.subr.bf16.mxu1 %v3826_v12 }
  0x10   :  { %3304 = vmatmul.mubr.msk.bf16.gmra.mrb[4].mxu0 %vm131_vm1, %v3813_v5 }
  0x11   :  { %215 = vmatprep.mubr.bf16.mxu0 %v4237_v1  ;;  %3625 = vmatpush3.bf16.msra.mxu1 %v3827_v14 }
  0x12   :  { %3626 = vmatprep.subr.bf16.mxu1 %v3828_v15 }
  0x15   :  { %3627 = vmatpush3.bf16.msra.mxu1 %v3829_v16 }
  0x16   :  { %3628 = vmatprep.subr.bf16.mxu1 %v3830_v17 }
  0x18   :  { %3305 = vmatmul.mubr.msk.bf16.gmra.mrb[8].mxu0 %vm131_vm1, %v3814_v13 }
  0x19   :  { %225 = vmatprep.mubr.bf16.mxu0 %v4237_v1  ;;  %3629 = vmatpush3.bf16.msra.mxu1 %v3831_v23 }
  0x1a   :  { %3630 = vmatprep.subr.bf16.mxu1 %v3832_v24 }
  0x1d   :  { %3631 = vmatpush3.bf16.msra.mxu1 %v3833_v25 }
  0x1e   :  { %3632 = vmatprep.subr.bf16.mxu1 %v3834_v26 }
  0x20   :  { %3306 = vmatmul.mubr.msk.bf16.gmra.mrb[12].mxu0 %vm131_vm1, %v3815_v18 }
  0x21   :  { %235 = vmatprep.mubr.bf16.mxu0 %v4237_v1  ;;  %3633 = vmatpush3.bf16.msra.mxu1 %v3835_v27 }
  0x28   :  { %3307 = vmatmul.mubr.msk.bf16.gmra.mrb[16].mxu0 %vm131_vm1, %v3816_v19 }
  0x29   :  { %245 = vmatprep.mubr.bf16.mxu0 %v4237_v1 }
  0x30   :  { %3308 = vmatmul.mubr.msk.bf16.gmra.mrb[20].mxu0 %vm131_vm1, %v3817_v20 }
  0x31   :  { %255 = vmatprep.mubr.bf16.mxu0 %v4237_v1 }
  0x38   :  { %3309 = vmatmul.mubr.msk.bf16.gmra.mrb[24].mxu0 %vm131_vm1, %v3818_v21 }
  0x39   :  { %265 = vmatprep.mubr.bf16.mxu0 %v4237_v1 }
  0x40   :  { %3310 = vmatmul.mubr.msk.bf16.gmra.mrb[28].mxu0 %vm131_vm1, %v3819_v22 }
  0x41   :  { %799 = vmatprep.mubr.bf16.mxu0 %v4237_v1 }
  0xdb   :  { %v197_v39 = vpop.f32.mrb[0].mxu0 }
  0xdc   :  { %v198_v40 = vadd.f32 %v197_v39, %v4429_v37  ;;  %v199_v41 = vpop.f32.mrb[1].mxu0 }
  0xdd   :  { %v200_v42 = vadd.f32 %v199_v41, %v4432_v38  ;;  %v201_v43 = vpop.f32.mrb[2].mxu0 }
  0xde   :  { %v202_v44 = vadd.f32 %v201_v43, %v4429_v37  ;;  %v203_v45 = vpop.f32.mrb[3].mxu0  ;;  %v276_v47 = vmax.f32 %v198_v40, 0.0 }
  0xdf   :  { %v204_v46 = vadd.f32 %v203_v45, %v4432_v38  ;;  %v277_v49 = vmax.f32 %v200_v42, 0.0 }
  0xe0   :  { %v278_v48 = vmax.f32 %v202_v44, 0.0 }
  0xe1   :  { %v279_v50 = vmax.f32 %v204_v46, 0.0 }
  0xe2   :  { %v308_v51 = vpack.c.bf16 %v278_v48, %v276_v47 }
  0xe3   :  { %v207_v52 = vpop.f32.mrb[4].mxu0  ;;  %v309_v53 = vpack.c.bf16 %v279_v50, %v277_v49 }
  0xe4   :  { %v208_v54 = vadd.f32 %v207_v52, %v4429_v37  ;;  %v209_v55 = vpop.f32.mrb[5].mxu0 }
  0xe5   :  { %v210_v56 = vadd.f32 %v209_v55, %v4432_v38  ;;  %v211_v57 = vpop.f32.mrb[6].mxu0  ;;  %491 = vmatprep.mubr.bf16.mxu1 %v309_v53 }
  0xe6   :  { %v212_v58 = vadd.f32 %v211_v57, %v4429_v37  ;;  %v213_v59 = vpop.f32.mrb[7].mxu0  ;;  %492 = vmatmul.mubr.bf16.vlgmr.msra.gmra.mrb[0].mxu1 %v308_v51  ;;  %v280_v61 = vmax.f32 %v208_v54, 0.0 }
  0xe7   :  { %v214_v60 = vadd.f32 %v213_v59, %v4432_v38  ;;  %v281_v63 = vmax.f32 %v210_v56, 0.0 }
  0xe8   :  { %v282_v62 = vmax.f32 %v212_v58, 0.0 }
  0xe9   :  { %v283_v0 = vmax.f32 %v214_v60, 0.0 }
  0xea   :  { %v310_v2 = vpack.c.bf16 %v282_v62, %v280_v61 }
  0xeb   :  { %v311_v3 = vpack.c.bf16 %v283_v0, %v281_v63  ;;  %v217_v4 = vpop.f32.mrb[8].mxu0 }
  0xec   :  { %v218_v5 = vadd.f32 %v217_v4, %v4429_v37  ;;  %v219_v6 = vpop.f32.mrb[9].mxu0 }
  0xed   :  { %v220_v7 = vadd.f32 %v219_v6, %v4432_v38  ;;  %v221_v8 = vpop.f32.mrb[10].mxu0  ;;  %499 = vmatprep.mubr.bf16.mxu1 %v311_v3 }
  0xee   :  { %v222_v9 = vadd.f32 %v221_v8, %v4429_v37  ;;  %v223_v10 = vpop.f32.mrb[11].mxu0  ;;  %500 = vmatmul.mubr.bf16.gmra.mrb[4].mxu1 %v310_v2  ;;  %v284_v12 = vmax.f32 %v218_v5, 0.0 }
  0xef   :  { %v224_v11 = vadd.f32 %v223_v10, %v4432_v38  ;;  %v285_v14 = vmax.f32 %v220_v7, 0.0 }
  0xf0   :  { %v286_v13 = vmax.f32 %v222_v9, 0.0 }
  0xf1   :  { %v287_v15 = vmax.f32 %v224_v11, 0.0 }
  0xf2   :  { %v312_v16 = vpack.c.bf16 %v286_v13, %v284_v12 }
  0xf3   :  { %v313_v17 = vpack.c.bf16 %v287_v15, %v285_v14  ;;  %v227_v18 = vpop.f32.mrb[12].mxu0 }
  0xf4   :  { %v228_v19 = vadd.f32 %v227_v18, %v4429_v37  ;;  %v229_v20 = vpop.f32.mrb[13].mxu0 }
  0xf5   :  { %v230_v21 = vadd.f32 %v229_v20, %v4432_v38  ;;  %v231_v22 = vpop.f32.mrb[14].mxu0  ;;  %507 = vmatprep.mubr.bf16.mxu1 %v313_v17 }
  0xf6   :  { %v232_v23 = vadd.f32 %v231_v22, %v4429_v37  ;;  %v233_v24 = vpop.f32.mrb[15].mxu0  ;;  %508 = vmatmul.mubr.bf16.gmra.mrb[8].mxu1 %v312_v16  ;;  %v288_v26 = vmax.f32 %v228_v19, 0.0 }
  0xf7   :  { %v234_v25 = vadd.f32 %v233_v24, %v4432_v38  ;;  %v289_v28 = vmax.f32 %v230_v21, 0.0 }
  0xf8   :  { %v290_v27 = vmax.f32 %v232_v23, 0.0 }
  0xf9   :  { %v291_v29 = vmax.f32 %v234_v25, 0.0 }
  0xfa   :  { %v314_v30 = vpack.c.bf16 %v290_v27, %v288_v26 }
  0xfb   :  { %v315_v31 = vpack.c.bf16 %v291_v29, %v289_v28  ;;  %v237_v32 = vpop.f32.mrb[16].mxu0 }
  0xfc   :  { %v238_v35 = vadd.f32 %v237_v32, %v4429_v37  ;;  %v239_v39 = vpop.f32.mrb[17].mxu0 }
  0xfd   :  { %v240_v40 = vadd.f32 %v239_v39, %v4432_v38  ;;  %v241_v41 = vpop.f32.mrb[18].mxu0  ;;  %515 = vmatprep.mubr.bf16.mxu1 %v315_v31  ;;  %v3841_v39 = vld [vmem:[%s5414_s6] ss:$16 sps:$4 sm:$0xff]  }
  0xfe   :  { %v242_v42 = vadd.f32 %v241_v41, %v4429_v37  ;;  %v243_v43 = vpop.f32.mrb[19].mxu0  ;;  %516 = vmatmul.mubr.bf16.gmra.mrb[12].mxu1 %v314_v30  ;;  %v292_v45 = vmax.f32 %v238_v35, 0.0  ;;  %v3838_v30 = vld [vmem:[%s5413_s0] sm:$0xff]  }
  0xff   :  { %v244_v44 = vadd.f32 %v243_v43, %v4432_v38  ;;  %v293_v47 = vmax.f32 %v240_v40, 0.0  ;;  %3334 = vmatmul.mubr.msk.bf16.vlgmr.msra.gmra.mrb[32].mxu0 %vm750_vm3, %v3838_v30  ;;  %v3843_v35 = vld [vmem:[%s5414_s6 + $0x4] ss:$16 sps:$4 sm:$0xff]   ;;  %v3844_v41 = vld [vmem:[%s5414_s6 + $0x20] ss:$16 sps:$4 sm:$0xff]  }
 0x100   :  { %v294_v46 = vmax.f32 %v242_v42, 0.0  ;;  %842 = vmatprep.mubr.bf16.mxu0 %v4237_v1  ;;  %v3846_v40 = vld [vmem:[%s5414_s6 + $0x24] ss:$16 sps:$4 sm:$0xff]   ;;  %v3847_v43 = vld [vmem:[%s5414_s6 + $0x40] ss:$16 sps:$4 sm:$0xff]  }
 0x101   :  { %v295_v48 = vmax.f32 %v244_v44, 0.0  ;;  %v3849_v42 = vld [vmem:[%s5414_s6 + $0x44] ss:$16 sps:$4 sm:$0xff]  }
 0x102   :  { %v316_v49 = vpack.c.bf16 %v294_v46, %v292_v45  ;;  %v3852_v44 = vld [vmem:[%s5414_s6 + $0x64] ss:$16 sps:$4 sm:$0xff]   ;;  %v3850_v45 = vld [vmem:[%s5414_s6 + $0x60] ss:$16 sps:$4 sm:$0xff]  }
 0x103   :  { %v317_v50 = vpack.c.bf16 %v295_v48, %v293_v47  ;;  %v247_v51 = vpop.f32.mrb[20].mxu0  ;;  %v3855_v46 = vld [vmem:[%s5414_s6 + $0x84] ss:$16 sps:$4 sm:$0xff]   ;;  %v3853_v47 = vld [vmem:[%s5414_s6 + $0x80] ss:$16 sps:$4 sm:$0xff]  }
 0x104   :  { %v248_v52 = vadd.f32 %v247_v51, %v4429_v37  ;;  %v249_v53 = vpop.f32.mrb[21].mxu0  ;;  %v3858_v48 = vld [vmem:[%s5414_s6 + $0xa4] ss:$16 sps:$4 sm:$0xff]   ;;  %v3859_v51 = vld [vmem:[%s5414_s6 + $0xc0] ss:$16 sps:$4 sm:$0xff]  }
 0x105   :  { %v250_v54 = vadd.f32 %v249_v53, %v4432_v38  ;;  %v251_v55 = vpop.f32.mrb[22].mxu0  ;;  %523 = vmatprep.mubr.bf16.mxu1 %v317_v50  ;;  %v3861_v50 = vld [vmem:[%s5414_s6 + $0xc4] ss:$16 sps:$4 sm:$0xff]   ;;  %v3862_v53 = vld [vmem:[%s5414_s6 + $0xe0] ss:$16 sps:$4 sm:$0xff]  }
 0x106   :  { %v252_v56 = vadd.f32 %v251_v55, %v4429_v37  ;;  %v253_v57 = vpop.f32.mrb[23].mxu0  ;;  %524 = vmatmul.mubr.bf16.gmra.mrb[16].mxu1 %v316_v49  ;;  %v296_v59 = vmax.f32 %v248_v52, 0.0  ;;  %v3856_v49 = vld [vmem:[%s5414_s6 + $0xa0] ss:$16 sps:$4 sm:$0xff]   ;;  %v3864_v52 = vld [vmem:[%s5414_s6 + $0xe4] ss:$16 sps:$4 sm:$0xff]  }
 0x107   :  { %v254_v58 = vadd.f32 %v253_v57, %v4432_v38  ;;  %v297_v61 = vmax.f32 %v250_v54, 0.0  ;;  %v3867_v54 = vld [vmem:[%s5414_s6 + $0xc] ss:$16 sps:$4 sm:$0xff]   ;;  %v3889_v55 = vld [vmem:[%s5415_s9] ss:$16 sps:$4 sm:$0xff]  }
 0x108   :  { %v298_v60 = vmax.f32 %v252_v56, 0.0  ;;  %v3891_v56 = vld [vmem:[%s5415_s9 + $0x4] ss:$16 sps:$4 sm:$0xff]  }
 0x109   :  { %v299_v62 = vmax.f32 %v254_v58, 0.0  ;;  %1986 = vmatprep.subr.bf16.mxu1 %v3891_v56  ;;  %v3897_v57 = vld [vmem:[%s5415_s9 + $0x24] ss:$16 sps:$4 sm:$0xff]   ;;  %v3895_v58 = vld [vmem:[%s5415_s9 + $0x20] ss:$16 sps:$4 sm:$0xff]  }
 0x10a   :  { %v318_v63 = vpack.c.bf16 %v298_v60, %v296_v59  ;;  %1987 = vmatpush1.bf16.msra.mxu1 %v3889_v55  ;;  %v3903_v59 = vld [vmem:[%s5415_s9 + $0x44] ss:$16 sps:$4 sm:$0xff]   ;;  %v3931_v56 = vld [vmem:[%s5415_s9 + $0xe0] ss:$16 sps:$4 sm:$0xff]  }
 0x10b   :  { %v319_v0 = vpack.c.bf16 %v299_v62, %v297_v61  ;;  %v257_v2 = vpop.f32.mrb[24].mxu0  ;;  %1988 = vmatprep.subr.bf16.mxu1 %v3897_v57  ;;  %v4545_v61 = vld [vmem:[%s5416_s5] ss:$0 sm:$0xff] }
 0x10c   :  { %v258_v3 = vadd.f32 %v257_v2, %v4429_v37  ;;  %v259_v4 = vpop.f32.mrb[25].mxu0 }
 0x10d   :  { %v260_v5 = vadd.f32 %v259_v4, %v4432_v38  ;;  %v261_v6 = vpop.f32.mrb[26].mxu0  ;;  %531 = vmatprep.mubr.bf16.mxu1 %v319_v0 }
 0x10e   :  { %v262_v7 = vadd.f32 %v261_v6, %v4429_v37  ;;  %v263_v8 = vpop.f32.mrb[27].mxu0  ;;  %532 = vmatmul.mubr.bf16.gmra.mrb[20].mxu1 %v318_v63  ;;  %v300_v10 = vmax.f32 %v258_v3, 0.0  ;;  %v3901_v63 = vld [vmem:[%s5415_s9 + $0x40] ss:$16 sps:$4 sm:$0xff]   ;;  %v3909_v3 = vld [vmem:[%s5415_s9 + $0x64] ss:$16 sps:$4 sm:$0xff]  }
 0x10f   :  { %v264_v9 = vadd.f32 %v263_v8, %v4432_v38  ;;  %v301_v12 = vmax.f32 %v260_v5, 0.0  ;;  %1989 = vmatpush1.bf16.msra.mxu1 %v3895_v58 }
 0x110   :  { %v302_v11 = vmax.f32 %v262_v7, 0.0  ;;  %1990 = vmatprep.subr.bf16.mxu1 %v3903_v59  ;;  %v3907_v7 = vld [vmem:[%s5415_s9 + $0x60] ss:$16 sps:$4 sm:$0xff]  }
 0x111   :  { %v303_v13 = vmax.f32 %v264_v9, 0.0 }
 0x112   :  { %v320_v14 = vpack.c.bf16 %v302_v11, %v300_v10  ;;  %v3915_v10 = vld [vmem:[%s5415_s9 + $0x84] ss:$16 sps:$4 sm:$0xff]  }
 0x113   :  { %v321_v15 = vpack.c.bf16 %v303_v13, %v301_v12  ;;  %v267_v16 = vpop.f32.mrb[28].mxu0  ;;  %1991 = vmatpush1.bf16.msra.mxu1 %v3901_v63 }
 0x114   :  { %v268_v17 = vadd.f32 %v267_v16, %v4429_v37  ;;  %v269_v18 = vpop.f32.mrb[29].mxu0  ;;  %1992 = vmatprep.subr.bf16.mxu1 %v3909_v3 }
 0x115   :  { %v270_v19 = vadd.f32 %v269_v18, %v4432_v38  ;;  %v271_v20 = vpop.f32.mrb[30].mxu0  ;;  %539 = vmatprep.mubr.bf16.mxu1 %v321_v15  ;;  %v3913_v15 = vld [vmem:[%s5415_s9 + $0x80] ss:$16 sps:$4 sm:$0xff]  }
 0x116   :  { %v272_v21 = vadd.f32 %v271_v20, %v4429_v37  ;;  %v273_v22 = vpop.f32.mrb[31].mxu0  ;;  %540 = vmatmul.mubr.bf16.gmra.mrb[24].mxu1 %v320_v14  ;;  %v304_v24 = vmax.f32 %v268_v17, 0.0  ;;  %v734_v37 = vld [vmem:[%s5411_s7 + $0x8] sm:$0x77]  ;;  %v3921_v20 = vld [vmem:[%s5415_s9 + $0xa4] ss:$16 sps:$4 sm:$0xff]  }
 0x117   :  { %v274_v23 = vadd.f32 %v273_v22, %v4432_v38  ;;  %v305_v26 = vmax.f32 %v270_v19, 0.0  ;;  %v3332_v31 = vcombine.high %v734_v37, %v734_v37  ;;  %v3331_v38 = vcombine.low %v734_v37, %v734_v37  ;;  %1993 = vmatpush1.bf16.msra.mxu1 %v3907_v7  ;;  %v3927_v37 = vld [vmem:[%s5415_s9 + $0xc4] ss:$16 sps:$4 sm:$0xff]  }
 0x118   :  { %v306_v25 = vmax.f32 %v272_v21, 0.0  ;;  %1994 = vmatprep.subr.bf16.mxu1 %v3915_v10  ;;  %v3937_v10 = vld [vmem:[%s5415_s9 + $0x100] ss:$16 sps:$4 sm:$0xff]  }
 0x119   :  { %v307_v27 = vmax.f32 %v274_v23, 0.0  ;;  %3335 = vmatprep.subr.msk.bf16.mxu0 %vm754_vm2, %v3332_v31  ;;  %v762_v32 = vsel %vm754_vm2, %v3331_v38, 0 }
 0x11a   :  { %v322_v28 = vpack.c.bf16 %v306_v25, %v304_v24  ;;  %811 = vmatpush1.bf16.msra.mxu0 %v762_v32 }
 0x11b   :  { %v323_v29 = vpack.c.bf16 %v307_v27, %v305_v26  ;;  %1068 = vmatprep.subr.bf16.mxu0 %v3843_v35  ;;  %1995 = vmatpush1.bf16.msra.mxu1 %v3913_v15  ;;  %v3919_v26 = vld [vmem:[%s5415_s9 + $0xa0] ss:$16 sps:$4 sm:$0xff]  }
 0x11c   :  { %1996 = vmatprep.subr.bf16.mxu1 %v3921_v20 }
 0x11d   :  { %547 = vmatprep.mubr.bf16.mxu1 %v323_v29  ;;  %3336 = vmatmul.mubr.msk.bf16.vlgmr.msra.gmra.mrb[36].mxu0 %vm750_vm3, %v3838_v30 }
 0x11e   :  { %548 = vmatmul.mubr.bf16.gmra.mrb[28].mxu1 %v322_v28  ;;  %1069 = vmatpush1.bf16.msra.mxu0 %v3841_v39 }
 0x11f   :  { %1100 = vmatprep.mubr.bf16.mxu0 %v4237_v1  ;;  %1070 = vmatprep.subr.bf16.mxu0 %v3846_v40 }
 0x120   :  { %1997 = vmatpush1.bf16.msra.mxu1 %v3919_v26 }
 0x121   :  { %1998 = vmatprep.subr.bf16.mxu1 %v3927_v37  ;;  %v3951_v37 = vld [vmem:[%s5415_s9 + $0x144] ss:$16 sps:$4 sm:$0xff]  }
 0x122   :  { %1071 = vmatpush1.bf16.msra.mxu0 %v3844_v41  ;;  %v3925_v41 = vld [vmem:[%s5415_s9 + $0xc0] ss:$16 sps:$4 sm:$0xff]  }
 0x123   :  { %1072 = vmatprep.subr.bf16.mxu0 %v3849_v42 }
 0x124   :  { %1999 = vmatpush1.bf16.msra.mxu1 %v3925_v41 }
 0x126   :  { %1073 = vmatpush1.bf16.msra.mxu0 %v3847_v43 }
 0x127   :  { %1074 = vmatprep.subr.bf16.mxu0 %v3852_v44 }
 0x12a   :  { %1075 = vmatpush1.bf16.msra.mxu0 %v3850_v45 }
 0x12b   :  { %1076 = vmatprep.subr.bf16.mxu0 %v3855_v46 }
 0x12e   :  { %1077 = vmatpush1.bf16.msra.mxu0 %v3853_v47  ;;  %v3933_v47 = vld [vmem:[%s5415_s9 + $0xe4] ss:$16 sps:$4 sm:$0xff]  }
 0x12f   :  { %1078 = vmatprep.subr.bf16.mxu0 %v3858_v48  ;;  %2000 = vmatprep.subr.bf16.mxu1 %v3933_v47 }
 0x130   :  { %2001 = vmatpush1.bf16.msra.mxu1 %v3931_v56 }
 0x132   :  { %1079 = vmatpush1.bf16.msra.mxu0 %v3856_v49 }
 0x133   :  { %1080 = vmatprep.subr.bf16.mxu0 %v3861_v50 }
 0x136   :  { %1081 = vmatpush1.bf16.msra.mxu0 %v3859_v51 }
 0x137   :  { %1082 = vmatprep.subr.bf16.mxu0 %v3864_v52 }
 0x13a   :  { %1083 = vmatpush1.bf16.msra.mxu0 %v3862_v53 }
 0x13b   :  { %1111 = vmatprep.subr.bf16.mxu0 %v3867_v54 }
 0x1b9   :  { %v3634_v60 = vpop.f32.mrb[0].mxu1 }
 0x1ba   :  { %v3635_v62 = vpop.f32.mrb[1].mxu1 }
 0x1bb   :  { %v3636_v0 = vadd.f32 %v3635_v62, %v3634_v60  ;;  %v3637_v2 = vpop.f32.mrb[2].mxu1  ;;  %v3939_v62 = vld [vmem:[%s5415_s9 + $0x104] ss:$16 sps:$4 sm:$0xff]  }
 0x1bc   :  { %v3638_v4 = vpop.f32.mrb[3].mxu1  ;;  %2002 = vmatprep.subr.bf16.mxu1 %v3939_v62 }
 0x1bd   :  { %v494_v5 = vadd.f32 %v3636_v0, %v4545_v61  ;;  %v3639_v6 = vadd.f32 %v3638_v4, %v3637_v2  ;;  %2003 = vmatpush1.bf16.msra.mxu1 %v3937_v10 }
 0x1bf   :  { %v556_v8 = vmax.f32 %v494_v5, 0.0  ;;  %v497_v9 = vadd.f32 %v3639_v6, %v4545_v61 }
 0x1c1   :  { %v572_v11 = vrot.slane %v556_v8, 4  ;;  %v557_v12 = vmax.f32 %v497_v9, 0.0  ;;  %v3640_v13 = vpop.f32.mrb[4].mxu1 }
 0x1c2   :  { %v3641_v14 = vpop.f32.mrb[5].mxu1 }
 0x1c3   :  { %v573_v16 = vadd.f32 %v572_v11, %v556_v8  ;;  %v578_v17 = vrot.slane %v557_v12, 4  ;;  %v3642_v18 = vadd.f32 %v3641_v14, %v3640_v13  ;;  %v3643_v19 = vpop.f32.mrb[6].mxu1 }
 0x1c4   :  { %v3644_v21 = vpop.f32.mrb[7].mxu1 }
 0x1c5   :  { %v574_v22 = vrot.slane %v573_v16, 2  ;;  %v579_v23 = vadd.f32 %v578_v17, %v557_v12  ;;  %v502_v24 = vadd.f32 %v3642_v18, %v4545_v61  ;;  %v3645_v25 = vadd.f32 %v3644_v21, %v3643_v19 }
 0x1c7   :  { %v575_v27 = vadd.f32 %v574_v22, %v573_v16  ;;  %v580_v28 = vrot.slane %v579_v23, 2  ;;  %v558_v29 = vmax.f32 %v502_v24, 0.0  ;;  %v505_v30 = vadd.f32 %v3645_v25, %v4545_v61  ;;  %v3945_v16 = vld [vmem:[%s5415_s9 + $0x124] ss:$16 sps:$4 sm:$0xff]  }
 0x1c8   :  { %2004 = vmatprep.subr.bf16.mxu1 %v3945_v16 }
 0x1c9   :  { %v576_v31 = vrot.slane %v575_v27, 1  ;;  %v581_v38 = vadd.f32 %v580_v28, %v579_v23  ;;  %v584_v32 = vrot.slane %v558_v29, 4  ;;  %v559_v35 = vmax.f32 %v505_v30, 0.0  ;;  %v3646_v39 = vpop.f32.mrb[8].mxu1 }
 0x1ca   :  { %v3647_v40 = vpop.f32.mrb[9].mxu1 }
 0x1cb   :  { %v577_v42 = vadd.f32 %v576_v31, %v575_v27  ;;  %v582_v43 = vrot.slane %v581_v38, 1  ;;  %v585_v44 = vadd.f32 %v584_v32, %v558_v29  ;;  %v590_v45 = vrot.slane %v559_v35, 4  ;;  %v3649_v46 = vpop.f32.mrb[10].mxu1  ;;  %v3943_v27 = vld [vmem:[%s5415_s9 + $0x120] ss:$16 sps:$4 sm:$0xff]  }
 0x1cc   :  { %v3648_v48 = vadd.f32 %v3647_v40, %v3646_v39  ;;  %v3650_v49 = vpop.f32.mrb[11].mxu1  ;;  %2005 = vmatpush1.bf16.msra.mxu1 %v3943_v27 }
 0x1cd   :  { %v669_v50 = vmul.f32 0.125, %v577_v42  ;;  %v583_v51 = vadd.f32 %v582_v43, %v581_v38  ;;  %v586_v52 = vrot.slane %v585_v44, 2  ;;  %v591_v53 = vadd.f32 %v590_v45, %v559_v35  ;;  %2006 = vmatprep.subr.bf16.mxu1 %v3951_v37 }
 0x1ce   :  { %v510_v54 = vadd.f32 %v3648_v48, %v4545_v61  ;;  %v3651_v55 = vadd.f32 %v3650_v49, %v3649_v46  ;;  %v3949_v46 = vld [vmem:[%s5415_s9 + $0x140] ss:$16 sps:$4 sm:$0xff]  }
 0x1cf   :  { %v685_v57 = vpack.c.bf16 %v669_v50, %v669_v50  ;;  %v670_v58 = vmul.f32 0.125, %v583_v51  ;;  %v587_v59 = vadd.f32 %v586_v52, %v585_v44  ;;  %v592_v60 = vrot.slane %v591_v53, 2  ;;  %v3957_v52 = vld [vmem:[%s5415_s9 + $0x164] ss:$16 sps:$4 sm:$0xff]  }
 0x1d0   :  { %v560_v63 = vmax.f32 %v510_v54, 0.0  ;;  %v513_v0 = vadd.f32 %v3651_v55, %v4545_v61  ;;  %2007 = vmatpush1.bf16.msra.mxu1 %v3949_v46 }
 0x1d1   :  { %v686_v2 = vpack.c.bf16 %v670_v58, %v670_v58  ;;  %v588_v3 = vrot.slane %v587_v59, 1  ;;  %v593_v4 = vadd.f32 %v592_v60, %v591_v53  ;;  %v3652_v5 = vpop.f32.mrb[12].mxu1  ;;  %v869_v6 = vunpack.c.l.b16 %v685_v57  ;;  %2008 = vmatprep.subr.bf16.mxu1 %v3957_v52 }
 0x1d2   :  { %v596_v7 = vrot.slane %v560_v63, 4  ;;  %v561_v8 = vmax.f32 %v513_v0, 0.0  ;;  %v3653_v9 = vpop.f32.mrb[13].mxu1 }
 0x1d3   :  { %v870_v11 = vunpack.c.l.b16 %v686_v2  ;;  %v589_v12 = vadd.f32 %v588_v3, %v587_v59  ;;  %v594_v13 = vrot.slane %v593_v4, 1  ;;  %v3654_v14 = vadd.f32 %v3653_v9, %v3652_v5  ;;  %v3655_v15 = vpop.f32.mrb[14].mxu1  ;;  %v3955_v2 = vld [vmem:[%s5415_s9 + $0x160] ss:$16 sps:$4 sm:$0xff]  }
 0x1d4   :  { %v597_v17 = vadd.f32 %v596_v7, %v560_v63  ;;  %v602_v18 = vrot.slane %v561_v8, 4  ;;  %v3656_v19 = vpop.f32.mrb[15].mxu1  ;;  %2009 = vmatpush1.bf16.msra.mxu1 %v3955_v2 }
 0x1d5   :  { %v886_v20 = vsel %vm885_vm4, %v870_v11, %v869_v6  ;;  %v671_v21 = vmul.f32 0.125, %v589_v12  ;;  %v595_v22 = vadd.f32 %v594_v13, %v593_v4  ;;  %v518_v23 = vadd.f32 %v3654_v14, %v4545_v61  ;;  %v3963_v6 = vld [vmem:[%s5415_s9 + $0x184] ss:$16 sps:$4 sm:$0xff]  }
 0x1d6   :  { %v598_v24 = vrot.slane %v597_v17, 2  ;;  %v603_v25 = vadd.f32 %v602_v18, %v561_v8  ;;  %v3657_v26 = vadd.f32 %v3656_v19, %v3655_v15  ;;  %v3961_v18 = vld [vmem:[%s5415_s9 + $0x180] ss:$16 sps:$4 sm:$0xff]   ;;  %2010 = vmatprep.subr.bf16.mxu1 %v3963_v6 }
 0x1d7   :  { %v687_v28 = vpack.c.bf16 %v671_v21, %v671_v21  ;;  %v672_v29 = vmul.f32 0.125, %v595_v22  ;;  %v562_v30 = vmax.f32 %v518_v23, 0.0 }
 0x1d8   :  { %v599_v31 = vadd.f32 %v598_v24, %v597_v17  ;;  %v604_v38 = vrot.slane %v603_v25, 2  ;;  %v521_v32 = vadd.f32 %v3657_v26, %v4545_v61  ;;  %v3969_v24 = vld [vmem:[%s5415_s9 + $0x1a4] ss:$16 sps:$4 sm:$0xff]   ;;  %2011 = vmatpush1.bf16.msra.mxu1 %v3961_v18 }
 0x1d9   :  { %v871_v35 = vunpack.c.l.b16 %v687_v28  ;;  %v688_v39 = vpack.c.bf16 %v672_v29, %v672_v29  ;;  %v608_v40 = vrot.slane %v562_v30, 4  ;;  %v3658_v41 = vpop.f32.mrb[16].mxu1  ;;  %v3967_v29 = vld [vmem:[%s5415_s9 + $0x1a0] ss:$16 sps:$4 sm:$0xff]   ;;  %2012 = vmatprep.subr.bf16.mxu1 %v3969_v24 }
 0x1da   :  { %v600_v42 = vrot.slane %v599_v31, 1  ;;  %v605_v43 = vadd.f32 %v604_v38, %v603_v25  ;;  %v563_v44 = vmax.f32 %v521_v32, 0.0  ;;  %v3659_v45 = vpop.f32.mrb[17].mxu1 }
 0x1db   :  { %v888_v47 = vsel %vm887_vm5, %v871_v35, %v886_v20  ;;  %v872_v48 = vunpack.c.l.b16 %v688_v39  ;;  %v609_v49 = vadd.f32 %v608_v40, %v562_v30  ;;  %v3660_v50 = vadd.f32 %v3659_v45, %v3658_v41  ;;  %v3661_v51 = vpop.f32.mrb[18].mxu1 }
 0x1dc   :  { %v601_v53 = vadd.f32 %v600_v42, %v599_v31  ;;  %v606_v54 = vrot.slane %v605_v43, 1  ;;  %v614_v55 = vrot.slane %v563_v44, 4  ;;  %v3662_v56 = vpop.f32.mrb[19].mxu1  ;;  %2013 = vmatpush1.bf16.msra.mxu1 %v3967_v29 }
 0x1dd   :  { %v890_v57 = vsel %vm889_vm6, %v872_v48, %v888_v47  ;;  %v610_v58 = vrot.slane %v609_v49, 2  ;;  %v526_v59 = vadd.f32 %v3660_v50, %v4545_v61  ;;  %v3663_v60 = vadd.f32 %v3662_v56, %v3661_v51 }
 0x1de   :  { %v673_v62 = vmul.f32 0.125, %v601_v53  ;;  %v607_v63 = vadd.f32 %v606_v54, %v605_v43  ;;  %v615_v0 = vadd.f32 %v614_v55, %v563_v44 }
 0x1df   :  { %v611_v3 = vadd.f32 %v610_v58, %v609_v49  ;;  %v564_v4 = vmax.f32 %v526_v59, 0.0  ;;  %v529_v5 = vadd.f32 %v3663_v60, %v4545_v61 }
 0x1e0   :  { %v689_v7 = vpack.c.bf16 %v673_v62, %v673_v62  ;;  %v674_v8 = vmul.f32 0.125, %v607_v63  ;;  %v616_v9 = vrot.slane %v615_v0, 2 }
 0x1e1   :  { %v612_v10 = vrot.slane %v611_v3, 1  ;;  %v620_v11 = vrot.slane %v564_v4, 4  ;;  %v565_v12 = vmax.f32 %v529_v5, 0.0  ;;  %v3664_v13 = vpop.f32.mrb[20].mxu1 }
 0x1e2   :  { %v873_v14 = vunpack.c.l.b16 %v689_v7  ;;  %v690_v15 = vpack.c.bf16 %v674_v8, %v674_v8  ;;  %v617_v16 = vadd.f32 %v616_v9, %v615_v0  ;;  %v3665_v17 = vpop.f32.mrb[21].mxu1 }
 0x1e3   :  { %v613_v19 = vadd.f32 %v612_v10, %v611_v3  ;;  %v621_v20 = vadd.f32 %v620_v11, %v564_v4  ;;  %v626_v21 = vrot.slane %v565_v12, 4  ;;  %v3666_v22 = vadd.f32 %v3665_v17, %v3664_v13  ;;  %v3667_v23 = vpop.f32.mrb[22].mxu1 }
 0x1e4   :  { %v892_v25 = vsel %vm891_vm7, %v873_v14, %v890_v57  ;;  %v874_v26 = vunpack.c.l.b16 %v690_v15  ;;  %v618_v27 = vrot.slane %v617_v16, 1  ;;  %v3668_v28 = vpop.f32.mrb[23].mxu1 }
 0x1e5   :  { %v675_v30 = vmul.f32 0.125, %v613_v19  ;;  %v622_v37 = vrot.slane %v621_v20, 2  ;;  %v627_v31 = vadd.f32 %v626_v21, %v565_v12  ;;  %v534_v38 = vadd.f32 %v3666_v22, %v4545_v61 }
 0x1e6   :  { %v619_v32 = vadd.f32 %v618_v27, %v617_v16  ;;  %v3669_v35 = vadd.f32 %v3668_v28, %v3667_v23  ;;  %v894_v39 = vsel %vm893_vm8, %v874_v26, %v892_v25 }
 0x1e7   :  { %v691_v40 = vpack.c.bf16 %v675_v30, %v675_v30  ;;  %v623_v41 = vadd.f32 %v622_v37, %v621_v20  ;;  %v628_v42 = vrot.slane %v627_v31, 2  ;;  %v566_v43 = vmax.f32 %v534_v38, 0.0 }
 0x1e8   :  { %v676_v44 = vmul.f32 0.125, %v619_v32  ;;  %v537_v45 = vadd.f32 %v3669_v35, %v4545_v61 }
 0x1e9   :  { %v875_v46 = vunpack.c.l.b16 %v691_v40  ;;  %v624_v47 = vrot.slane %v623_v41, 1  ;;  %v629_v48 = vadd.f32 %v628_v42, %v627_v31  ;;  %v632_v49 = vrot.slane %v566_v43, 4  ;;  %v3670_v50 = vpop.f32.mrb[24].mxu1 }
 0x1ea   :  { %v692_v51 = vpack.c.bf16 %v676_v44, %v676_v44  ;;  %v567_v52 = vmax.f32 %v537_v45, 0.0  ;;  %v3671_v53 = vpop.f32.mrb[25].mxu1 }
 0x1eb   :  { %v625_v54 = vadd.f32 %v624_v47, %v623_v41  ;;  %v630_v55 = vrot.slane %v629_v48, 1  ;;  %v633_v56 = vadd.f32 %v632_v49, %v566_v43  ;;  %v3672_v57 = vadd.f32 %v3671_v53, %v3670_v50  ;;  %v3673_v58 = vpop.f32.mrb[26].mxu1 }
 0x1ec   :  { %v876_v59 = vunpack.c.l.b16 %v692_v51  ;;  %v638_v60 = vrot.slane %v567_v52, 4  ;;  %v3674_v62 = vpop.f32.mrb[27].mxu1  ;;  %v896_v63 = vsel %vm895_vm9, %v875_v46, %v894_v39 }
 0x1ed   :  { %v677_v0 = vmul.f32 0.125, %v625_v54  ;;  %v631_v2 = vadd.f32 %v630_v55, %v629_v48  ;;  %v634_v3 = vrot.slane %v633_v56, 2  ;;  %v542_v4 = vadd.f32 %v3672_v57, %v4545_v61 }
 0x1ee   :  { %v639_v5 = vadd.f32 %v638_v60, %v567_v52  ;;  %v3675_v6 = vadd.f32 %v3674_v62, %v3673_v58  ;;  %v4636_v7 = vsel %vm897_vm10, %v876_v59, %v896_v63 }
 0x1ef   :  { %v693_v8 = vpack.c.bf16 %v677_v0, %v677_v0  ;;  %v678_v9 = vmul.f32 0.125, %v631_v2  ;;  %v635_v10 = vadd.f32 %v634_v3, %v633_v56  ;;  %v568_v11 = vmax.f32 %v542_v4, 0.0 }
 0x1f0   :  { %v640_v12 = vrot.slane %v639_v5, 2  ;;  %v545_v13 = vadd.f32 %v3675_v6, %v4545_v61 }
 0x1f1   :  { %v694_v14 = vpack.c.bf16 %v678_v9, %v678_v9  ;;  %v636_v15 = vrot.slane %v635_v10, 1  ;;  %v644_v16 = vrot.slane %v568_v11, 4  ;;  %v3676_v17 = vpop.f32.mrb[28].mxu1  ;;  %v877_v18 = vunpack.c.l.b16 %v693_v8 }
 0x1f2   :  { %v641_v19 = vadd.f32 %v640_v12, %v639_v5  ;;  %v569_v20 = vmax.f32 %v545_v13, 0.0  ;;  %v3677_v21 = vpop.f32.mrb[29].mxu1 }
 0x1f3   :  { %v878_v22 = vunpack.c.l.b16 %v694_v14  ;;  %v637_v23 = vadd.f32 %v636_v15, %v635_v10  ;;  %v645_v24 = vadd.f32 %v644_v16, %v568_v11  ;;  %v3678_v25 = vadd.f32 %v3677_v21, %v3676_v17  ;;  %v3679_v26 = vpop.f32.mrb[30].mxu1 }
 0x1f4   :  { %v642_v27 = vrot.slane %v641_v19, 1  ;;  %v650_v28 = vrot.slane %v569_v20, 4  ;;  %v3680_v29 = vpop.f32.mrb[31].mxu1 }
 0x1f5   :  { %v899_v30 = vsel %vm885_vm4, %v878_v22, %v877_v18  ;;  %v679_v37 = vmul.f32 0.125, %v637_v23  ;;  %v646_v31 = vrot.slane %v645_v24, 2  ;;  %v550_v38 = vadd.f32 %v3678_v25, %v4545_v61  ;;  %v3865_v22 = vld [vmem:[%s5414_s6 + $0x8] ss:$16 sps:$4 sm:$0xff]   ;;  %v3870_v25 = vld [vmem:[%s5414_s6 + $0x2c] ss:$16 sps:$4 sm:$0xff]  }
 0x1f6   :  { %v643_v32 = vadd.f32 %v642_v27, %v641_v19  ;;  %v651_v35 = vadd.f32 %v650_v28, %v569_v20  ;;  %v3681_v39 = vadd.f32 %v3680_v29, %v3679_v26  ;;  %v3868_v26 = vld [vmem:[%s5414_s6 + $0x28] ss:$16 sps:$4 sm:$0xff]   ;;  %v3873_v27 = vld [vmem:[%s5414_s6 + $0x4c] ss:$16 sps:$4 sm:$0xff]  }
 0x1f7   :  { %v695_v40 = vpack.c.bf16 %v679_v37, %v679_v37  ;;  %v647_v41 = vadd.f32 %v646_v31, %v645_v24  ;;  %v570_v42 = vmax.f32 %v550_v38, 0.0  ;;  %v3876_v28 = vld [vmem:[%s5414_s6 + $0x6c] ss:$16 sps:$4 sm:$0xff]   ;;  %v3880_v31 = vld [vmem:[%s5414_s6 + $0xa8] ss:$16 sps:$4 sm:$0xff]  }
 0x1f8   :  { %v680_v43 = vmul.f32 0.125, %v643_v32  ;;  %v652_v44 = vrot.slane %v651_v35, 2  ;;  %v553_v45 = vadd.f32 %v3681_v39, %v4545_v61  ;;  %v3879_v29 = vld [vmem:[%s5414_s6 + $0x8c] ss:$16 sps:$4 sm:$0xff]   ;;  %v3883_v32 = vld [vmem:[%s5414_s6 + $0xc8] ss:$16 sps:$4 sm:$0xff]  }
 0x1f9   :  { %v879_v46 = vunpack.c.l.b16 %v695_v40  ;;  %v648_v47 = vrot.slane %v647_v41, 1  ;;  %v656_v48 = vrot.slane %v570_v42, 4  ;;  %v3882_v37 = vld [vmem:[%s5414_s6 + $0xac] ss:$16 sps:$4 sm:$0xff]   ;;  %v3886_v39 = vld [vmem:[%s5414_s6 + $0xe8] ss:$16 sps:$4 sm:$0xff]  }
 0x1fa   :  { %v696_v49 = vpack.c.bf16 %v680_v43, %v680_v43  ;;  %v653_v50 = vadd.f32 %v652_v44, %v651_v35  ;;  %v571_v51 = vmax.f32 %v553_v45, 0.0  ;;  %v3885_v38 = vld [vmem:[%s5414_s6 + $0xcc] ss:$16 sps:$4 sm:$0xff]   ;;  %v3898_v43 = vld [vmem:[%s5415_s9 + $0x28] ss:$16 sps:$4 sm:$0xff]  }
 0x1fb   :  { %v900_v52 = vsel %vm887_vm5, %v879_v46, %v899_v30  ;;  %v649_v53 = vadd.f32 %v648_v47, %v647_v41  ;;  %v657_v54 = vadd.f32 %v656_v48, %v570_v42  ;;  %v3877_v30 = vld [vmem:[%s5414_s6 + $0x88] ss:$16 sps:$4 sm:$0xff]   ;;  %v3888_v35 = vld [vmem:[%s5414_s6 + $0xec] ss:$16 sps:$4 sm:$0xff]  }
 0x1fc   :  { %v880_v55 = vunpack.c.l.b16 %v696_v49  ;;  %v654_v56 = vrot.slane %v653_v50, 1  ;;  %v662_v57 = vrot.slane %v571_v51, 4  ;;  %v3894_v40 = vld [vmem:[%s5415_s9 + $0xc] ss:$16 sps:$4 sm:$0xff]   ;;  %v3892_v41 = vld [vmem:[%s5415_s9 + $0x8] ss:$16 sps:$4 sm:$0xff]  }
 0x1fd   :  { %v681_v58 = vmul.f32 0.125, %v649_v53  ;;  %v658_v59 = vrot.slane %v657_v54, 2  ;;  %v3900_v42 = vld [vmem:[%s5415_s9 + $0x2c] ss:$16 sps:$4 sm:$0xff]   ;;  %v3904_v45 = vld [vmem:[%s5415_s9 + $0x48] ss:$16 sps:$4 sm:$0xff]  }
 0x1fe   :  { %v901_v60 = vsel %vm889_vm6, %v880_v55, %v900_v52  ;;  %v655_v62 = vadd.f32 %v654_v56, %v653_v50  ;;  %v663_v63 = vadd.f32 %v662_v57, %v571_v51  ;;  %v3906_v44 = vld [vmem:[%s5415_s9 + $0x4c] ss:$16 sps:$4 sm:$0xff]   ;;  %v3910_v47 = vld [vmem:[%s5415_s9 + $0x68] ss:$16 sps:$4 sm:$0xff]  }
 0x1ff   :  { %v697_v61 = vpack.c.bf16 %v681_v58, %v681_v58  ;;  %v659_v0 = vadd.f32 %v658_v59, %v657_v54  ;;  %v3912_v46 = vld [vmem:[%s5415_s9 + $0x6c] ss:$16 sps:$4 sm:$0xff]   ;;  %v3916_v49 = vld [vmem:[%s5415_s9 + $0x88] ss:$16 sps:$4 sm:$0xff]  }
 0x200   :  { %v682_v2 = vmul.f32 0.125, %v655_v62  ;;  %v664_v3 = vrot.slane %v663_v63, 2  ;;  %v3918_v48 = vld [vmem:[%s5415_s9 + $0x8c] ss:$16 sps:$4 sm:$0xff]   ;;  %v3922_v51 = vld [vmem:[%s5415_s9 + $0xa8] ss:$16 sps:$4 sm:$0xff]  }
 0x201   :  { %v881_v4 = vunpack.c.l.b16 %v697_v61  ;;  %v660_v5 = vrot.slane %v659_v0, 1  ;;  %v3924_v50 = vld [vmem:[%s5415_s9 + $0xac] ss:$16 sps:$4 sm:$0xff]   ;;  %v3928_v53 = vld [vmem:[%s5415_s9 + $0xc8] ss:$16 sps:$4 sm:$0xff]  }
 0x202   :  { %v698_v6 = vpack.c.bf16 %v682_v2, %v682_v2  ;;  %v665_v8 = vadd.f32 %v664_v3, %v663_v63  ;;  %v3930_v52 = vld [vmem:[%s5415_s9 + $0xcc] ss:$16 sps:$4 sm:$0xff]   ;;  %v3934_v55 = vld [vmem:[%s5415_s9 + $0xe8] ss:$16 sps:$4 sm:$0xff]  }
 0x203   :  { %v902_v9 = vsel %vm891_vm7, %v881_v4, %v901_v60  ;;  %v661_v10 = vadd.f32 %v660_v5, %v659_v0  ;;  %v3936_v54 = vld [vmem:[%s5415_s9 + $0xec] ss:$16 sps:$4 sm:$0xff]   ;;  %v3940_v57 = vld [vmem:[%s5415_s9 + $0x108] ss:$16 sps:$4 sm:$0xff]   ;;  %v3975_v5 = vld [vmem:[%s5415_s9 + $0x1c4] ss:$16 sps:$4 sm:$0xff]  }
 0x204   :  { %v882_v11 = vunpack.c.l.b16 %v698_v6  ;;  %v666_v12 = vrot.slane %v665_v8, 1  ;;  %v3942_v56 = vld [vmem:[%s5415_s9 + $0x10c] ss:$16 sps:$4 sm:$0xff]   ;;  %v3946_v59 = vld [vmem:[%s5415_s9 + $0x128] ss:$16 sps:$4 sm:$0xff]   ;;  %2014 = vmatprep.subr.bf16.mxu1 %v3975_v5 }
 0x205   :  { %v683_v13 = vmul.f32 0.125, %v661_v10  ;;  %v3948_v58 = vld [vmem:[%s5415_s9 + $0x12c] ss:$16 sps:$4 sm:$0xff]   ;;  %v3952_v62 = vld [vmem:[%s5415_s9 + $0x148] ss:$16 sps:$4 sm:$0xff]  }
 0x206   :  { %v667_v14 = vadd.f32 %v666_v12, %v665_v8  ;;  %v903_v15 = vsel %vm893_vm8, %v882_v11, %v902_v9  ;;  %v3954_v60 = vld [vmem:[%s5415_s9 + $0x14c] ss:$16 sps:$4 sm:$0xff]   ;;  %v3958_v61 = vld [vmem:[%s5415_s9 + $0x168] ss:$16 sps:$4 sm:$0xff]   ;;  %v3973_v8 = vld [vmem:[%s5415_s9 + $0x1c0] ss:$16 sps:$4 sm:$0xff]  }
 0x207   :  { %v699_v16 = vpack.c.bf16 %v683_v13, %v683_v13  ;;  %v3960_v63 = vld [vmem:[%s5415_s9 + $0x16c] ss:$16 sps:$4 sm:$0xff]   ;;  %v3964_v2 = vld [vmem:[%s5415_s9 + $0x188] ss:$16 sps:$4 sm:$0xff]   ;;  %2015 = vmatpush1.bf16.msra.mxu1 %v3973_v8  ;;  %v3981_v10 = vld [vmem:[%s5415_s9 + $0x1e4] ss:$16 sps:$4 sm:$0xff]  }
 0x208   :  { %v684_v17 = vmul.f32 0.125, %v667_v14  ;;  %v3966_v0 = vld [vmem:[%s5415_s9 + $0x18c] ss:$16 sps:$4 sm:$0xff]   ;;  %v3970_v4 = vld [vmem:[%s5415_s9 + $0x1a8] ss:$16 sps:$4 sm:$0xff]   ;;  %2016 = vmatprep.subr.bf16.mxu1 %v3981_v10 }
 0x209   :  { %v883_v18 = vunpack.c.l.b16 %v699_v16  ;;  %v3972_v3 = vld [vmem:[%s5415_s9 + $0x1ac] ss:$16 sps:$4 sm:$0xff]   ;;  %v3976_v9 = vld [vmem:[%s5415_s9 + $0x1c8] ss:$16 sps:$4 sm:$0xff]   ;;  %v3979_v12 = vld [vmem:[%s5415_s9 + $0x1e0] ss:$16 sps:$4 sm:$0xff]  }
 0x20a   :  { %v700_v19 = vpack.c.bf16 %v684_v17, %v684_v17  ;;  %v3978_v6 = vld [vmem:[%s5415_s9 + $0x1cc] ss:$16 sps:$4 sm:$0xff]   ;;  %v3982_v13 = vld [vmem:[%s5415_s9 + $0x1e8] ss:$16 sps:$4 sm:$0xff]   ;;  %v3987_v14 = vld [vmem:[%s5415_s9 + $0x204] ss:$16 sps:$4 sm:$0xff]  }
 0x20b   :  { %v904_v20 = vsel %vm895_vm9, %v883_v18, %v903_v15  ;;  %v3984_v11 = vld [vmem:[%s5415_s9 + $0x1ec] ss:$16 sps:$4 sm:$0xff]   ;;  %2017 = vmatpush1.bf16.msra.mxu1 %v3979_v12  ;;  %v4812_v16 = vld [vmem:[%s5418_s8] sm:$0xf] }
 0x20c   :  { %v884_v21 = vunpack.c.l.b16 %v700_v19  ;;  %v3990_v15 = vld [vmem:[%s5415_s9 + $0x20c] ss:$16 sps:$4 sm:$0xff]   ;;  %2029 = vmatprep.subr.bf16.mxu1 %v3987_v14  ;;  %v1159_v17 = vrot.slane %v4812_v16, %v4420_v34  ;;  %v1163_v18 = vrot.slane %v4812_v16, %v4426_v36  ;;  %v4027_v12 = vld [vmem:[%s5415_s9 + $0x2e0] ss:$16 sps:$4 sm:$0xff]  }
 0x20d   :  { %v4032_v5 = vld [vmem:[%s5415_s9 + $0x2ec] ss:$16 sps:$4 sm:$0xff]  }
 0x20e   :  { %v905_v23 = vsel %vm897_vm10, %v884_v21, %v904_v20 }
 0x20f   :  { %v906_v24 = vpack.c.b16 %v905_v23, %v4636_v7  ;;  %v3871_v7 = vld [vmem:[%s5414_s6 + $0x48] ss:$16 sps:$4 sm:$0xff]  }
 0x211   :  { %1101 = vmatmul.mubr.bf16.vlgmr.msra.gmra.mrb[32].mxu0 %v906_v24 }
 0x212   :  { %1112 = vmatpush1.bf16.msra.mxu0 %v3865_v22  ;;  %1143 = vmatprep.mubr.bf16.mxu0 %v4237_v1  ;;  %v3874_v1 = vld [vmem:[%s5414_s6 + $0x68] ss:$16 sps:$4 sm:$0xff]  }
 0x213   :  { %1113 = vmatprep.subr.bf16.mxu0 %v3870_v25 }
 0x216   :  { %1114 = vmatpush1.bf16.msra.mxu0 %v3868_v26 }
 0x217   :  { %1115 = vmatprep.subr.bf16.mxu0 %v3873_v27 }
 0x21a   :  { %1116 = vmatpush1.bf16.msra.mxu0 %v3871_v7 }
 0x21b   :  { %1117 = vmatprep.subr.bf16.mxu0 %v3876_v28 }
 0x21e   :  { %1118 = vmatpush1.bf16.msra.mxu0 %v3874_v1 }
 0x21f   :  { %1119 = vmatprep.subr.bf16.mxu0 %v3879_v29 }
 0x222   :  { %1120 = vmatpush1.bf16.msra.mxu0 %v3877_v30 }
 0x223   :  { %1121 = vmatprep.subr.bf16.mxu0 %v3882_v37  ;;  %v3985_v37 = vld [vmem:[%s5415_s9 + $0x200] ss:$16 sps:$4 sm:$0xff]  }
 0x226   :  { %1122 = vmatpush1.bf16.msra.mxu0 %v3880_v31  ;;  %v3988_v31 = vld [vmem:[%s5415_s9 + $0x208] ss:$16 sps:$4 sm:$0xff]  }
 0x227   :  { %1123 = vmatprep.subr.bf16.mxu0 %v3885_v38  ;;  %v3993_v38 = vld [vmem:[%s5415_s9 + $0x224] ss:$16 sps:$4 sm:$0xff]  }
 0x22a   :  { %1124 = vmatpush1.bf16.msra.mxu0 %v3883_v32  ;;  %v3996_v32 = vld [vmem:[%s5415_s9 + $0x22c] ss:$16 sps:$4 sm:$0xff]  }
 0x22b   :  { %1125 = vmatprep.subr.bf16.mxu0 %v3888_v35  ;;  %v3991_v35 = vld [vmem:[%s5415_s9 + $0x220] ss:$16 sps:$4 sm:$0xff]  }
 0x22e   :  { %1126 = vmatpush1.bf16.msra.mxu0 %v3886_v39  ;;  %v3994_v39 = vld [vmem:[%s5415_s9 + $0x228] ss:$16 sps:$4 sm:$0xff]  }
 0x22f   :  { %2072 = vmatprep.subr.bf16.mxu0 %v3894_v40  ;;  %v3999_v40 = vld [vmem:[%s5415_s9 + $0x244] ss:$16 sps:$4 sm:$0xff]  }
 0x231   :  { %1144 = vmatmul.mubr.bf16.vlgmr.msra.gmra.mrb[36].mxu0 %v906_v24 }
 0x232   :  { %2073 = vmatpush1.bf16.msra.mxu0 %v3892_v41  ;;  %v4002_v41 = vld [vmem:[%s5415_s9 + $0x24c] ss:$16 sps:$4 sm:$0xff]  }
 0x233   :  { %2074 = vmatprep.subr.bf16.mxu0 %v3900_v42  ;;  %v3997_v42 = vld [vmem:[%s5415_s9 + $0x240] ss:$16 sps:$4 sm:$0xff]  }
 0x236   :  { %2075 = vmatpush1.bf16.msra.mxu0 %v3898_v43  ;;  %v4000_v43 = vld [vmem:[%s5415_s9 + $0x248] ss:$16 sps:$4 sm:$0xff]  }
 0x237   :  { %2076 = vmatprep.subr.bf16.mxu0 %v3906_v44  ;;  %v4005_v44 = vld [vmem:[%s5415_s9 + $0x264] ss:$16 sps:$4 sm:$0xff]  }
 0x23a   :  { %2077 = vmatpush1.bf16.msra.mxu0 %v3904_v45  ;;  %v4008_v45 = vld [vmem:[%s5415_s9 + $0x26c] ss:$16 sps:$4 sm:$0xff]  }
 0x23b   :  { %2078 = vmatprep.subr.bf16.mxu0 %v3912_v46  ;;  %v4003_v46 = vld [vmem:[%s5415_s9 + $0x260] ss:$16 sps:$4 sm:$0xff]  }
 0x23e   :  { %2079 = vmatpush1.bf16.msra.mxu0 %v3910_v47  ;;  %v4006_v47 = vld [vmem:[%s5415_s9 + $0x268] ss:$16 sps:$4 sm:$0xff]  }
 0x23f   :  { %2080 = vmatprep.subr.bf16.mxu0 %v3918_v48  ;;  %v4011_v48 = vld [vmem:[%s5415_s9 + $0x284] ss:$16 sps:$4 sm:$0xff]  }
 0x242   :  { %2081 = vmatpush1.bf16.msra.mxu0 %v3916_v49  ;;  %v4014_v49 = vld [vmem:[%s5415_s9 + $0x28c] ss:$16 sps:$4 sm:$0xff]  }
 0x243   :  { %2082 = vmatprep.subr.bf16.mxu0 %v3924_v50  ;;  %v4009_v50 = vld [vmem:[%s5415_s9 + $0x280] ss:$16 sps:$4 sm:$0xff]  }
 0x246   :  { %2083 = vmatpush1.bf16.msra.mxu0 %v3922_v51  ;;  %v4012_v51 = vld [vmem:[%s5415_s9 + $0x288] ss:$16 sps:$4 sm:$0xff]  }
 0x247   :  { %2084 = vmatprep.subr.bf16.mxu0 %v3930_v52  ;;  %v4017_v52 = vld [vmem:[%s5415_s9 + $0x2a4] ss:$16 sps:$4 sm:$0xff]  }
 0x24a   :  { %2085 = vmatpush1.bf16.msra.mxu0 %v3928_v53  ;;  %v4020_v53 = vld [vmem:[%s5415_s9 + $0x2ac] ss:$16 sps:$4 sm:$0xff]  }
 0x24b   :  { %2086 = vmatprep.subr.bf16.mxu0 %v3936_v54  ;;  %v4879_v54 = vsub.s32 2, %v4417_v33 }
 0x24e   :  { %2087 = vmatpush1.bf16.msra.mxu0 %v3934_v55  ;;  %v1170_v55 = vsub.s32 3, %v4417_v33 }
 0x24f   :  { %2088 = vmatprep.subr.bf16.mxu0 %v3942_v56  ;;  %v4015_v56 = vld [vmem:[%s5415_s9 + $0x2a0] ss:$16 sps:$4 sm:$0xff]  }
 0x252   :  { %2089 = vmatpush1.bf16.msra.mxu0 %v3940_v57  ;;  %v4018_v57 = vld [vmem:[%s5415_s9 + $0x2a8] ss:$16 sps:$4 sm:$0xff]  }
 0x253   :  { %2090 = vmatprep.subr.bf16.mxu0 %v3948_v58  ;;  %v1167_v58 = vrot.slane %v4812_v16, %v4879_v54 }
 0x256   :  { %2091 = vmatpush1.bf16.msra.mxu0 %v3946_v59  ;;  %v4023_v59 = vld [vmem:[%s5415_s9 + $0x2c4] ss:$16 sps:$4 sm:$0xff]  }
 0x257   :  { %2092 = vmatprep.subr.bf16.mxu0 %v3954_v60  ;;  %v4026_v60 = vld [vmem:[%s5415_s9 + $0x2cc] ss:$16 sps:$4 sm:$0xff]  }
 0x25a   :  { %2093 = vmatpush1.bf16.msra.mxu0 %v3952_v62  ;;  %v1171_v62 = vrot.slane %v4812_v16, %v1170_v55  ;;  %v4035_v16 = vld [vmem:[%s5415_s9 + $0x304] ss:$16 sps:$4 sm:$0xff]  }
 0x25b   :  { %2094 = vmatprep.subr.bf16.mxu0 %v3960_v63 }
 0x25e   :  { %2095 = vmatpush1.bf16.msra.mxu0 %v3958_v61  ;;  %v4021_v61 = vld [vmem:[%s5415_s9 + $0x2c0] ss:$16 sps:$4 sm:$0xff]  }
 0x25f   :  { %2096 = vmatprep.subr.bf16.mxu0 %v3966_v0  ;;  %v4024_v0 = vld [vmem:[%s5415_s9 + $0x2c8] ss:$16 sps:$4 sm:$0xff]  }
 0x262   :  { %2097 = vmatpush1.bf16.msra.mxu0 %v3964_v2 }
 0x263   :  { %2098 = vmatprep.subr.bf16.mxu0 %v3972_v3 }
 0x266   :  { %2099 = vmatpush1.bf16.msra.mxu0 %v3970_v4  ;;  %v4029_v4 = vld [vmem:[%s5415_s9 + $0x2e4] ss:$16 sps:$4 sm:$0xff]  }
 0x267   :  { %2100 = vmatprep.subr.bf16.mxu0 %v3978_v6 }
 0x26a   :  { %2101 = vmatpush1.bf16.msra.mxu0 %v3976_v9 }
 0x26b   :  { %2102 = vmatprep.subr.bf16.mxu0 %v3984_v11 }
 0x26e   :  { %2103 = vmatpush1.bf16.msra.mxu0 %v3982_v13  ;;  %v4030_v13 = vld [vmem:[%s5415_s9 + $0x2e8] ss:$16 sps:$4 sm:$0xff]  }
 0x26f   :  { %2115 = vmatprep.subr.bf16.mxu0 %v3990_v15 }
 0x2e4   :  { %v1102_v19 = vpop.f32.mrb[32].mxu0 }
 0x2e5   :  { %v1176_v20 = vadd.f32 %v1159_v17, %v1102_v19  ;;  %v1104_v21 = vpop.f32.mrb[33].mxu0 }
 0x2e6   :  { %v1177_v22 = vadd.f32 %v1163_v18, %v1104_v21  ;;  %v1106_v23 = vpop.f32.mrb[34].mxu0 }
 0x2e7   :  { %v1180_v24 = vadd.f32 %v1159_v17, %v1106_v23  ;;  %v1108_v25 = vpop.f32.mrb[35].mxu0  ;;  %v1184_v27 = vmax.f32 %v1176_v20, 0.0  ;;  %v4038_v17 = vld [vmem:[%s5415_s9 + $0x30c] ss:$16 sps:$4 sm:$0xff]   ;;  %v4036_v23 = vld [vmem:[%s5415_s9 + $0x308] ss:$16 sps:$4 sm:$0xff]  }
 0x2e8   :  { %v1181_v26 = vadd.f32 %v1163_v18, %v1108_v25  ;;  %v1185_v28 = vmax.f32 %v1177_v22, 0.0  ;;  %v4033_v22 = vld [vmem:[%s5415_s9 + $0x300] ss:$16 sps:$4 sm:$0xff]   ;;  %v4044_v25 = vld [vmem:[%s5415_s9 + $0x32c] ss:$16 sps:$4 sm:$0xff]  }
 0x2e9   :  { %v1188_v7 = vmax.f32 %v1180_v24, 0.0  ;;  %v4041_v24 = vld [vmem:[%s5415_s9 + $0x324] ss:$16 sps:$4 sm:$0xff]  }
 0x2ea   :  { %v1189_v1 = vmax.f32 %v1181_v26, 0.0  ;;  %v4039_v26 = vld [vmem:[%s5415_s9 + $0x320] ss:$16 sps:$4 sm:$0xff]  }
 0x2eb   :  { %v1192_v29 = vpack.c.bf16 %v1188_v7, %v1184_v27  ;;  %v4042_v27 = vld [vmem:[%s5415_s9 + $0x328] ss:$16 sps:$4 sm:$0xff]   ;;  %v4047_v7 = vld [vmem:[%s5415_s9 + $0x344] ss:$16 sps:$4 sm:$0xff]  }
 0x2ec   :  { %v1193_v30 = vpack.c.bf16 %v1189_v1, %v1185_v28  ;;  %v4050_v28 = vld [vmem:[%s5415_s9 + $0x34c] ss:$16 sps:$4 sm:$0xff]   ;;  %v4045_v1 = vld [vmem:[%s5415_s9 + $0x340] ss:$16 sps:$4 sm:$0xff]  }
 0x2ee   :  { %2018 = vmatprep.mubr.bf16.mxu1 %v1193_v30  ;;  %2104 = vmatprep.mubr.bf16.mxu0 %v1193_v30  ;;  %v4053_v30 = vld [vmem:[%s5415_s9 + $0x364] ss:$16 sps:$4 sm:$0xff]  }
 0x2ef   :  { %2019 = vmatmul.mubr.bf16.vlgmr.msra.gmra.mrb[32].mxu1 %v1192_v29  ;;  %2105 = vmatmul.mubr.bf16.vlgmr.msra.gmra.mrb[40].mxu0 %v1192_v29  ;;  %v4048_v29 = vld [vmem:[%s5415_s9 + $0x348] ss:$16 sps:$4 sm:$0xff]  }
 0x2f0   :  { %2030 = vmatpush1.bf16.msra.mxu1 %v3985_v37  ;;  %2116 = vmatpush1.bf16.msra.mxu0 %v3988_v31  ;;  %v4056_v37 = vld [vmem:[%s5415_s9 + $0x36c] ss:$16 sps:$4 sm:$0xff]   ;;  %v4051_v31 = vld [vmem:[%s5415_s9 + $0x360] ss:$16 sps:$4 sm:$0xff]  }
 0x2f1   :  { %2031 = vmatprep.subr.bf16.mxu1 %v3993_v38  ;;  %2117 = vmatprep.subr.bf16.mxu0 %v3996_v32  ;;  %v4054_v38 = vld [vmem:[%s5415_s9 + $0x368] ss:$16 sps:$4 sm:$0xff]   ;;  %v4059_v32 = vld [vmem:[%s5415_s9 + $0x384] ss:$16 sps:$4 sm:$0xff]  }
 0x2f4   :  { %2032 = vmatpush1.bf16.msra.mxu1 %v3991_v35  ;;  %2118 = vmatpush1.bf16.msra.mxu0 %v3994_v39  ;;  %v4062_v35 = vld [vmem:[%s5415_s9 + $0x38c] ss:$16 sps:$4 sm:$0xff]   ;;  %v4057_v39 = vld [vmem:[%s5415_s9 + $0x380] ss:$16 sps:$4 sm:$0xff]  }
 0x2f5   :  { %2033 = vmatprep.subr.bf16.mxu1 %v3999_v40  ;;  %2119 = vmatprep.subr.bf16.mxu0 %v4002_v41  ;;  %v4060_v40 = vld [vmem:[%s5415_s9 + $0x388] ss:$16 sps:$4 sm:$0xff]   ;;  %v4065_v41 = vld [vmem:[%s5415_s9 + $0x3a4] ss:$16 sps:$4 sm:$0xff]  }
 0x2f8   :  { %2034 = vmatpush1.bf16.msra.mxu1 %v3997_v42  ;;  %2120 = vmatpush1.bf16.msra.mxu0 %v4000_v43  ;;  %v4068_v42 = vld [vmem:[%s5415_s9 + $0x3ac] ss:$16 sps:$4 sm:$0xff]   ;;  %v4063_v43 = vld [vmem:[%s5415_s9 + $0x3a0] ss:$16 sps:$4 sm:$0xff]  }
 0x2f9   :  { %2035 = vmatprep.subr.bf16.mxu1 %v4005_v44  ;;  %2121 = vmatprep.subr.bf16.mxu0 %v4008_v45  ;;  %v4066_v44 = vld [vmem:[%s5415_s9 + $0x3a8] ss:$16 sps:$4 sm:$0xff]   ;;  %v4071_v45 = vld [vmem:[%s5415_s9 + $0x3c4] ss:$16 sps:$4 sm:$0xff]  }
 0x2fc   :  { %2036 = vmatpush1.bf16.msra.mxu1 %v4003_v46  ;;  %2122 = vmatpush1.bf16.msra.mxu0 %v4006_v47  ;;  %v4074_v46 = vld [vmem:[%s5415_s9 + $0x3cc] ss:$16 sps:$4 sm:$0xff]   ;;  %v4069_v47 = vld [vmem:[%s5415_s9 + $0x3c0] ss:$16 sps:$4 sm:$0xff]  }
 0x2fd   :  { %2037 = vmatprep.subr.bf16.mxu1 %v4011_v48  ;;  %2123 = vmatprep.subr.bf16.mxu0 %v4014_v49  ;;  %v4072_v48 = vld [vmem:[%s5415_s9 + $0x3c8] ss:$16 sps:$4 sm:$0xff]   ;;  %v4077_v49 = vld [vmem:[%s5415_s9 + $0x3e4] ss:$16 sps:$4 sm:$0xff]  }
 0x300   :  { %2038 = vmatpush1.bf16.msra.mxu1 %v4009_v50  ;;  %2124 = vmatpush1.bf16.msra.mxu0 %v4012_v51  ;;  %v4080_v50 = vld [vmem:[%s5415_s9 + $0x3ec] ss:$16 sps:$4 sm:$0xff]   ;;  %v4075_v51 = vld [vmem:[%s5415_s9 + $0x3e0] ss:$16 sps:$4 sm:$0xff]  }
 0x301   :  { %2039 = vmatprep.subr.bf16.mxu1 %v4017_v52  ;;  %2125 = vmatprep.subr.bf16.mxu0 %v4020_v53  ;;  %v4078_v52 = vld [vmem:[%s5415_s9 + $0x3e8] ss:$16 sps:$4 sm:$0xff]   ;;  %v4083_v53 = vld [vmem:[%s5417_s11 + $0x4] ss:$12 sps:$4 sm:$0xff]  }
 0x304   :  { %v1145_v63 = vpop.f32.mrb[36].mxu0  ;;  %2040 = vmatpush1.bf16.msra.mxu1 %v4015_v56  ;;  %2126 = vmatpush1.bf16.msra.mxu0 %v4018_v57  ;;  %v4108_v56 = vld [vmem:[%s5417_s11 + $0xc8] ss:$12 sps:$4 sm:$0xff]   ;;  %v4081_v57 = vld [vmem:[%s5417_s11] ss:$12 sps:$4 sm:$0xff]  }
 0x305   :  { %v1178_v2 = vadd.f32 %v1167_v58, %v1145_v63  ;;  %v1147_v3 = vpop.f32.mrb[37].mxu0  ;;  %2041 = vmatprep.subr.bf16.mxu1 %v4023_v59  ;;  %2127 = vmatprep.subr.bf16.mxu0 %v4026_v60  ;;  %v4086_v59 = vld [vmem:[%s5417_s11 + $0x1c] ss:$12 sps:$4 sm:$0xff]   ;;  %v4113_v60 = vld [vmem:[%s5417_s11 + $0xe0] ss:$12 sps:$4 sm:$0xff]  }
 0x306   :  { %v1179_v6 = vadd.f32 %v1171_v62, %v1147_v3  ;;  %v1149_v8 = vpop.f32.mrb[38].mxu0  ;;  %v4114_v63 = vld [vmem:[%s5417_s11 + $0x20] ss:$12 sps:$4 sm:$0xff]   ;;  %v4119_v3 = vld [vmem:[%s5417_s11 + $0x38] ss:$12 sps:$4 sm:$0xff]  }
 0x307   :  { %v1182_v9 = vadd.f32 %v1167_v58, %v1149_v8  ;;  %v1151_v10 = vpop.f32.mrb[39].mxu0  ;;  %v1186_v14 = vmax.f32 %v1178_v2, 0.0  ;;  %v4109_v58 = vld [vmem:[%s5417_s11 + $0x8] ss:$12 sps:$4 sm:$0xff]   ;;  %v4087_v2 = vld [vmem:[%s5417_s11 + $0x30] ss:$12 sps:$4 sm:$0xff]  }
 0x308   :  { %v1183_v11 = vadd.f32 %v1171_v62, %v1151_v10  ;;  %2042 = vmatpush1.bf16.msra.mxu1 %v4021_v61  ;;  %2128 = vmatpush1.bf16.msra.mxu0 %v4024_v0  ;;  %v1187_v18 = vmax.f32 %v1179_v6, 0.0  ;;  %v4084_v62 = vld [vmem:[%s5417_s11 + $0x18] ss:$12 sps:$4 sm:$0xff]   ;;  %v4089_v61 = vld [vmem:[%s5417_s11 + $0x34] ss:$12 sps:$4 sm:$0xff]  }
 0x309   :  { %v1190_v15 = vmax.f32 %v1182_v9, 0.0  ;;  %2043 = vmatprep.subr.bf16.mxu1 %v4029_v4  ;;  %2129 = vmatprep.subr.bf16.mxu0 %v4032_v5  ;;  %v4118_v0 = vld [vmem:[%s5417_s11 + $0xf8] ss:$12 sps:$4 sm:$0xff]   ;;  %v4123_v5 = vld [vmem:[%s5417_s11 + $0x110] ss:$12 sps:$4 sm:$0xff]  }
 0x30a   :  { %v1191_v19 = vmax.f32 %v1183_v11, 0.0  ;;  %v4092_v4 = vld [vmem:[%s5417_s11 + $0x4c] ss:$12 sps:$4 sm:$0xff]   ;;  %v4090_v6 = vld [vmem:[%s5417_s11 + $0x48] ss:$12 sps:$4 sm:$0xff]  }
 0x30b   :  { %v4923_v20 = vpack.c.bf16 %v1190_v15, %v1186_v14  ;;  %v4124_v8 = vld [vmem:[%s5417_s11 + $0x50] ss:$12 sps:$4 sm:$0xff]   ;;  %v4128_v10 = vld [vmem:[%s5417_s11 + $0x128] ss:$12 sps:$4 sm:$0xff]   ;;  %v4093_v11 = vld [vmem:[%s5417_s11 + $0x60] ss:$12 sps:$4 sm:$0xff]  }
 0x30c   :  { %v1195_v21 = vpack.c.bf16 %v1191_v19, %v1187_v18  ;;  %2044 = vmatpush1.bf16.msra.mxu1 %v4027_v12  ;;  %2130 = vmatpush1.bf16.msra.mxu0 %v4030_v13  ;;  %v4095_v9 = vld [vmem:[%s5417_s11 + $0x64] ss:$12 sps:$4 sm:$0xff]   ;;  %v4129_v12 = vld [vmem:[%s5417_s11 + $0x68] ss:$12 sps:$4 sm:$0xff]   ;;  %v4133_v14 = vld [vmem:[%s5417_s11 + $0x140] ss:$12 sps:$4 sm:$0xff]  }
 0x30d   :  { %2045 = vmatprep.subr.bf16.mxu1 %v4035_v16  ;;  %2131 = vmatprep.subr.bf16.mxu0 %v4038_v17  ;;  %v4098_v13 = vld [vmem:[%s5417_s11 + $0x7c] ss:$12 sps:$4 sm:$0xff]   ;;  %v4096_v15 = vld [vmem:[%s5417_s11 + $0x78] ss:$12 sps:$4 sm:$0xff]   ;;  %v4101_v16 = vld [vmem:[%s5417_s11 + $0x94] ss:$12 sps:$4 sm:$0xff]  }
 0x30e   :  { %2061 = vmatprep.mubr.bf16.mxu1 %v1195_v21  ;;  %2147 = vmatprep.mubr.bf16.mxu0 %v1195_v21  ;;  %v4099_v17 = vld [vmem:[%s5417_s11 + $0x90] ss:$12 sps:$4 sm:$0xff]   ;;  %v4104_v18 = vld [vmem:[%s5417_s11 + $0xac] ss:$12 sps:$4 sm:$0xff]   ;;  %v4102_v19 = vld [vmem:[%s5417_s11 + $0xa8] ss:$12 sps:$4 sm:$0xff]  }
 0x30f   :  { %v4105_v21 = vld [vmem:[%s5417_s11 + $0xc0] ss:$12 sps:$4 sm:$0xff]  }
 0x310   :  { %2046 = vmatpush1.bf16.msra.mxu1 %v4033_v22  ;;  %2132 = vmatpush1.bf16.msra.mxu0 %v4036_v23  ;;  %v4112_v22 = vld [vmem:[%s5417_s11 + $0xdc] ss:$12 sps:$4 sm:$0xff]   ;;  %v4110_v23 = vld [vmem:[%s5417_s11 + $0xd8] ss:$12 sps:$4 sm:$0xff]  }
 0x311   :  { %2047 = vmatprep.subr.bf16.mxu1 %v4041_v24  ;;  %2133 = vmatprep.subr.bf16.mxu0 %v4044_v25  ;;  %v4117_v24 = vld [vmem:[%s5417_s11 + $0xf4] ss:$12 sps:$4 sm:$0xff]   ;;  %v4115_v25 = vld [vmem:[%s5417_s11 + $0xf0] ss:$12 sps:$4 sm:$0xff]  }
 0x314   :  { %2048 = vmatpush1.bf16.msra.mxu1 %v4039_v26  ;;  %2134 = vmatpush1.bf16.msra.mxu0 %v4042_v27  ;;  %v4122_v26 = vld [vmem:[%s5417_s11 + $0x10c] ss:$12 sps:$4 sm:$0xff]   ;;  %v4120_v27 = vld [vmem:[%s5417_s11 + $0x108] ss:$12 sps:$4 sm:$0xff]  }
 0x315   :  { %2049 = vmatprep.subr.bf16.mxu1 %v4047_v7  ;;  %2135 = vmatprep.subr.bf16.mxu0 %v4050_v28  ;;  %v4127_v7 = vld [vmem:[%s5417_s11 + $0x124] ss:$12 sps:$4 sm:$0xff]   ;;  %v4125_v28 = vld [vmem:[%s5417_s11 + $0x120] ss:$12 sps:$4 sm:$0xff]  }
 0x318   :  { %2050 = vmatpush1.bf16.msra.mxu1 %v4045_v1  ;;  %2136 = vmatpush1.bf16.msra.mxu0 %v4048_v29  ;;  %v4132_v1 = vld [vmem:[%s5417_s11 + $0x13c] ss:$12 sps:$4 sm:$0xff]   ;;  %v4130_v29 = vld [vmem:[%s5417_s11 + $0x138] ss:$12 sps:$4 sm:$0xff]  }
 0x319   :  { %2051 = vmatprep.subr.bf16.mxu1 %v4053_v30  ;;  %2137 = vmatprep.subr.bf16.mxu0 %v4056_v37  ;;  %v4134_v30 = vld [vmem:[%s5417_s11 + $0x80] ss:$12 sps:$4 sm:$0xff]  }
 0x31a   :  { %v4137_v37 = vld [vmem:[%s5417_s11 + $0x154] ss:$12 sps:$4 sm:$0xff]  }
 0x31c   :  { %2052 = vmatpush1.bf16.msra.mxu1 %v4051_v31  ;;  %2138 = vmatpush1.bf16.msra.mxu0 %v4054_v38  ;;  %v4135_v31 = vld [vmem:[%s5417_s11 + $0x150] ss:$12 sps:$4 sm:$0xff]   ;;  %v4138_v38 = vld [vmem:[%s5417_s11 + $0x158] ss:$12 sps:$4 sm:$0xff]  }
 0x31d   :  { %2053 = vmatprep.subr.bf16.mxu1 %v4059_v32  ;;  %2139 = vmatprep.subr.bf16.mxu0 %v4062_v35  ;;  %v4139_v32 = vld [vmem:[%s5417_s11 + $0x98] ss:$12 sps:$4 sm:$0xff]  }
 0x31e   :  { %v4142_v35 = vld [vmem:[%s5417_s11 + $0x16c] ss:$12 sps:$4 sm:$0xff]  }
 0x320   :  { %2054 = vmatpush1.bf16.msra.mxu1 %v4057_v39  ;;  %2140 = vmatpush1.bf16.msra.mxu0 %v4060_v40  ;;  %v4140_v39 = vld [vmem:[%s5417_s11 + $0x168] ss:$12 sps:$4 sm:$0xff]   ;;  %v4143_v40 = vld [vmem:[%s5417_s11 + $0x170] ss:$12 sps:$4 sm:$0xff]  }
 0x321   :  { %2055 = vmatprep.subr.bf16.mxu1 %v4065_v41  ;;  %2141 = vmatprep.subr.bf16.mxu0 %v4068_v42  ;;  %v4144_v41 = vld [vmem:[%s5417_s11 + $0xb0] ss:$12 sps:$4 sm:$0xff]  }
 0x322   :  { %v4147_v42 = vld [vmem:[%s5417_s11 + $0x184] ss:$12 sps:$4 sm:$0xff]  }
 0x324   :  { %2056 = vmatpush1.bf16.msra.mxu1 %v4063_v43  ;;  %2142 = vmatpush1.bf16.msra.mxu0 %v4066_v44  ;;  %v1324_v43 = vld [vmem:[%s5419_s10] sm:$0xf] }
 0x325   :  { %2057 = vmatprep.subr.bf16.mxu1 %v4071_v45  ;;  %2143 = vmatprep.subr.bf16.mxu0 %v4074_v46  ;;  %v1329_v44 = vrot.slane %v1324_v43, %v4420_v34  ;;  %v1337_v45 = vrot.slane %v1324_v43, %v4879_v54  ;;  %v1333_v46 = vrot.slane %v1324_v43, %v4426_v36 }
 0x328   :  { %2058 = vmatpush1.bf16.msra.mxu1 %v4069_v47  ;;  %2144 = vmatpush1.bf16.msra.mxu0 %v4072_v48  ;;  %v1341_v47 = vrot.slane %v1324_v43, %v1170_v55  ;;  %v4187_v43 = vld [vmem:[%s5417_s11 + $0x2d0] ss:$12 sps:$4 sm:$0xff]  }
 0x329   :  { %2059 = vmatprep.subr.bf16.mxu1 %v4077_v49  ;;  %2145 = vmatprep.subr.bf16.mxu0 %v4080_v50 }
 0x32c   :  { %2060 = vmatpush1.bf16.msra.mxu1 %v4075_v51  ;;  %2146 = vmatpush1.bf16.msra.mxu0 %v4078_v52 }
 0x32d   :  { %2827 = vmatprep.subr.bf16.mxu1 %v4083_v53  ;;  %3682 = vmatprep.subr.bf16.mxu0 %v4108_v56 }
 0x32f   :  { %2062 = vmatmul.mubr.bf16.vlgmr.msra.gmra.mrb[32].mxu1 %v4923_v20  ;;  %2148 = vmatmul.mubr.bf16.vlgmr.msra.gmra.mrb[40].mxu0 %v4923_v20  ;;  %v4107_v20 = vld [vmem:[%s5417_s11 + $0xc4] ss:$12 sps:$4 sm:$0xff]  }
 0x330   :  { %2828 = vmatpush1.bf16.msra.mxu1 %v4081_v57  ;;  %3683 = vmatpush3.bf16.msra.mxu0 %v4109_v58 }
 0x331   :  { %2829 = vmatprep.subr.bf16.mxu1 %v4086_v59  ;;  %3684 = vmatprep.subr.bf16.mxu0 %v4113_v60 }
 0x334   :  { %2830 = vmatpush1.bf16.msra.mxu1 %v4084_v62  ;;  %3685 = vmatpush3.bf16.msra.mxu0 %v4114_v63 }
 0x335   :  { %2831 = vmatprep.subr.bf16.mxu1 %v4089_v61  ;;  %3686 = vmatprep.subr.bf16.mxu0 %v4118_v0 }
 0x338   :  { %2832 = vmatpush1.bf16.msra.mxu1 %v4087_v2  ;;  %3687 = vmatpush3.bf16.msra.mxu0 %v4119_v3 }
 0x339   :  { %2833 = vmatprep.subr.bf16.mxu1 %v4092_v4  ;;  %3688 = vmatprep.subr.bf16.mxu0 %v4123_v5 }
 0x33c   :  { %2834 = vmatpush1.bf16.msra.mxu1 %v4090_v6  ;;  %3689 = vmatpush3.bf16.msra.mxu0 %v4124_v8 }
 0x33d   :  { %2835 = vmatprep.subr.bf16.mxu1 %v4095_v9  ;;  %3690 = vmatprep.subr.bf16.mxu0 %v4128_v10 }
 0x340   :  { %2836 = vmatpush1.bf16.msra.mxu1 %v4093_v11  ;;  %3691 = vmatpush3.bf16.msra.mxu0 %v4129_v12 }
 0x341   :  { %2837 = vmatprep.subr.bf16.mxu1 %v4098_v13  ;;  %3692 = vmatprep.subr.bf16.mxu0 %v4133_v14  ;;  %v4145_v14 = vld [vmem:[%s5417_s11 + $0x180] ss:$12 sps:$4 sm:$0xff]  }
 0x344   :  { %2838 = vmatpush1.bf16.msra.mxu1 %v4096_v15  ;;  %3693 = vmatpush3.bf16.msra.mxu0 %v4134_v30  ;;  %v4150_v15 = vld [vmem:[%s5417_s11 + $0x19c] ss:$12 sps:$4 sm:$0xff]   ;;  %v4172_v30 = vld [vmem:[%s5417_s11 + $0x258] ss:$12 sps:$4 sm:$0xff]  }
 0x345   :  { %2839 = vmatprep.subr.bf16.mxu1 %v4101_v16  ;;  %3694 = vmatprep.subr.bf16.mxu0 %v4138_v38  ;;  %v4148_v16 = vld [vmem:[%s5417_s11 + $0x198] ss:$12 sps:$4 sm:$0xff]  }
 0x346   :  { %v4180_v38 = vld [vmem:[%s5417_s11 + $0x28c] ss:$12 sps:$4 sm:$0xff]  }
 0x348   :  { %2840 = vmatpush1.bf16.msra.mxu1 %v4099_v17  ;;  %3695 = vmatpush3.bf16.msra.mxu0 %v4139_v32  ;;  %v4153_v17 = vld [vmem:[%s5417_s11 + $0x1b4] ss:$12 sps:$4 sm:$0xff]  }
 0x349   :  { %2841 = vmatprep.subr.bf16.mxu1 %v4104_v18  ;;  %3696 = vmatprep.subr.bf16.mxu0 %v4143_v40  ;;  %v4151_v18 = vld [vmem:[%s5417_s11 + $0x1b0] ss:$12 sps:$4 sm:$0xff]   ;;  %v4178_v32 = vld [vmem:[%s5417_s11 + $0x288] ss:$12 sps:$4 sm:$0xff]  }
 0x34a   :  { %v4186_v40 = vld [vmem:[%s5417_s11 + $0x2bc] ss:$12 sps:$4 sm:$0xff]  }
 0x34c   :  { %2842 = vmatpush1.bf16.msra.mxu1 %v4102_v19  ;;  %3697 = vmatpush3.bf16.msra.mxu0 %v4144_v41  ;;  %v4156_v19 = vld [vmem:[%s5417_s11 + $0x1cc] ss:$12 sps:$4 sm:$0xff]  }
 0x34d   :  { %2843 = vmatprep.subr.bf16.mxu1 %v4107_v20  ;;  %v4154_v20 = vld [vmem:[%s5417_s11 + $0x1c8] ss:$12 sps:$4 sm:$0xff]   ;;  %v4184_v41 = vld [vmem:[%s5417_s11 + $0x2b8] ss:$12 sps:$4 sm:$0xff]  }
 0x350   :  { %2844 = vmatpush1.bf16.msra.mxu1 %v4105_v21  ;;  %v4159_v21 = vld [vmem:[%s5417_s11 + $0x1e4] ss:$12 sps:$4 sm:$0xff]  }
 0x351   :  { %2845 = vmatprep.subr.bf16.mxu1 %v4112_v22  ;;  %v4157_v22 = vld [vmem:[%s5417_s11 + $0x1e0] ss:$12 sps:$4 sm:$0xff]  }
 0x354   :  { %2846 = vmatpush1.bf16.msra.mxu1 %v4110_v23  ;;  %v4162_v23 = vld [vmem:[%s5417_s11 + $0x1fc] ss:$12 sps:$4 sm:$0xff]  }
 0x355   :  { %2847 = vmatprep.subr.bf16.mxu1 %v4117_v24  ;;  %v4160_v24 = vld [vmem:[%s5417_s11 + $0x1f8] ss:$12 sps:$4 sm:$0xff]  }
 0x358   :  { %2848 = vmatpush1.bf16.msra.mxu1 %v4115_v25  ;;  %v4165_v25 = vld [vmem:[%s5417_s11 + $0x214] ss:$12 sps:$4 sm:$0xff]  }
 0x359   :  { %2849 = vmatprep.subr.bf16.mxu1 %v4122_v26  ;;  %v4163_v26 = vld [vmem:[%s5417_s11 + $0x210] ss:$12 sps:$4 sm:$0xff]  }
 0x35c   :  { %2850 = vmatpush1.bf16.msra.mxu1 %v4120_v27  ;;  %v4168_v27 = vld [vmem:[%s5417_s11 + $0x22c] ss:$12 sps:$4 sm:$0xff]  }
 0x35d   :  { %2851 = vmatprep.subr.bf16.mxu1 %v4127_v7  ;;  %v4166_v7 = vld [vmem:[%s5417_s11 + $0x228] ss:$12 sps:$4 sm:$0xff]  }
 0x360   :  { %2852 = vmatpush1.bf16.msra.mxu1 %v4125_v28  ;;  %v4171_v28 = vld [vmem:[%s5417_s11 + $0x244] ss:$12 sps:$4 sm:$0xff]  }
 0x361   :  { %2853 = vmatprep.subr.bf16.mxu1 %v4132_v1  ;;  %v4169_v1 = vld [vmem:[%s5417_s11 + $0x240] ss:$12 sps:$4 sm:$0xff]  }
 0x364   :  { %2854 = vmatpush1.bf16.msra.mxu1 %v4130_v29  ;;  %v4174_v29 = vld [vmem:[%s5417_s11 + $0x25c] ss:$12 sps:$4 sm:$0xff]  }
 0x365   :  { %2855 = vmatprep.subr.bf16.mxu1 %v4137_v37  ;;  %v4177_v37 = vld [vmem:[%s5417_s11 + $0x274] ss:$12 sps:$4 sm:$0xff]  }
 0x368   :  { %2856 = vmatpush1.bf16.msra.mxu1 %v4135_v31  ;;  %v4175_v31 = vld [vmem:[%s5417_s11 + $0x270] ss:$12 sps:$4 sm:$0xff]  }
 0x369   :  { %2857 = vmatprep.subr.bf16.mxu1 %v4142_v35  ;;  %v4183_v35 = vld [vmem:[%s5417_s11 + $0x2a4] ss:$12 sps:$4 sm:$0xff]  }
 0x36c   :  { %2858 = vmatpush1.bf16.msra.mxu1 %v4140_v39  ;;  %v4181_v39 = vld [vmem:[%s5417_s11 + $0x2a0] ss:$12 sps:$4 sm:$0xff]  }
 0x36d   :  { %2870 = vmatprep.subr.bf16.mxu1 %v4147_v42  ;;  %v4189_v42 = vld [vmem:[%s5417_s11 + $0x2d4] ss:$12 sps:$4 sm:$0xff]  }
 0x402   :  { %v2063_v48 = vpop.f32.mrb[32].mxu1  ;;  %v2149_v49 = vpop.f32.mrb[40].mxu0 }
 0x403   :  { %v3777_v50 = vadd.f32 %v2063_v48, %v1329_v44  ;;  %v3781_v51 = vadd.f32 %v2149_v49, %v1337_v45  ;;  %v2065_v52 = vpop.f32.mrb[33].mxu1  ;;  %v2151_v53 = vpop.f32.mrb[41].mxu0  ;;  %v4195_v48 = vld [vmem:[%s5417_s11 + $0x260] ss:$12 sps:$4 sm:$0xff]  }
 0x404   :  { %v3778_v56 = vadd.f32 %v2065_v52, %v1333_v46  ;;  %v3782_v57 = vadd.f32 %v2151_v53, %v1341_v47  ;;  %v2067_v58 = vpop.f32.mrb[34].mxu1  ;;  %v2153_v59 = vpop.f32.mrb[42].mxu0  ;;  %v4196_v49 = vld [vmem:[%s5417_s11 + $0x1a0] ss:$12 sps:$4 sm:$0xff]   ;;  %v4199_v52 = vld [vmem:[%s5417_s11 + $0x290] ss:$12 sps:$4 sm:$0xff]  }
 0x405   :  { %v3779_v60 = vadd.f32 %v2067_v58, %v1329_v44  ;;  %v3783_v62 = vadd.f32 %v2153_v59, %v1337_v45  ;;  %v2069_v63 = vpop.f32.mrb[35].mxu1  ;;  %v2155_v61 = vpop.f32.mrb[43].mxu0  ;;  %v2158_v3 = vmax.f32 %v3777_v50, 0.0  ;;  %v2160_v4 = vmax.f32 %v3781_v51, 0.0  ;;  %v4192_v44 = vld [vmem:[%s5417_s11 + $0x2ec] ss:$12 sps:$4 sm:$0xff]  }
 0x406   :  { %v3780_v0 = vadd.f32 %v2069_v63, %v1333_v46  ;;  %v3784_v2 = vadd.f32 %v2155_v61, %v1341_v47  ;;  %v2159_v5 = vmax.f32 %v3778_v56, 0.0  ;;  %v2161_v6 = vmax.f32 %v3782_v57, 0.0  ;;  %v4190_v45 = vld [vmem:[%s5417_s11 + $0x2e8] ss:$12 sps:$4 sm:$0xff]   ;;  %v4197_v50 = vld [vmem:[%s5417_s11 + $0x278] ss:$12 sps:$4 sm:$0xff]  }
 0x407   :  { %v2162_v33 = vmax.f32 %v3779_v60, 0.0  ;;  %v2164_v55 = vmax.f32 %v3783_v62, 0.0  ;;  %v4193_v46 = vld [vmem:[%s5417_s11 + $0x248] ss:$12 sps:$4 sm:$0xff]   ;;  %v4198_v51 = vld [vmem:[%s5417_s11 + $0x1b8] ss:$12 sps:$4 sm:$0xff]  }
 0x408   :  { %v2163_v8 = vmax.f32 %v3780_v0, 0.0  ;;  %v2165_v9 = vmax.f32 %v3784_v2, 0.0  ;;  %v4194_v47 = vld [vmem:[%s5417_s11 + $0x188] ss:$12 sps:$4 sm:$0xff]   ;;  %v4200_v53 = vld [vmem:[%s5417_s11 + $0x1d0] ss:$12 sps:$4 sm:$0xff]  }
 0x409   :  { %v2166_v10 = vpack.c.bf16 %v2162_v33, %v2158_v3  ;;  %v5172_v11 = vpack.c.bf16 %v2164_v55, %v2160_v4  ;;  %v4201_v56 = vld [vmem:[%s5417_s11 + $0x2a8] ss:$12 sps:$4 sm:$0xff]   ;;  %v4203_v58 = vld [vmem:[%s5417_s11 + $0x2c0] ss:$12 sps:$4 sm:$0xff]   ;;  %v4205_v60 = vld [vmem:[%s5417_s11 + $0x2d8] ss:$12 sps:$4 sm:$0xff]  }
 0x40a   :  { %v2167_v12 = vpack.c.bf16 %v2163_v8, %v2159_v5  ;;  %v5174_v13 = vpack.c.bf16 %v2165_v9, %v2161_v6  ;;  %v4202_v57 = vld [vmem:[%s5417_s11 + $0x1e8] ss:$12 sps:$4 sm:$0xff]   ;;  %v4204_v59 = vld [vmem:[%s5417_s11 + $0x200] ss:$12 sps:$4 sm:$0xff]   ;;  %v4206_v62 = vld [vmem:[%s5417_s11 + $0x218] ss:$12 sps:$4 sm:$0xff]  }
 0x40b   :  { %v4207_v63 = vld [vmem:[%s5417_s11 + $0x2f0] ss:$12 sps:$4 sm:$0xff]   ;;  %v4209_v0 = vld [vmem:[%s5420_s13 + $0x40] sm:$0xff]   ;;  %v4211_v3 = vld [vmem:[%s5420_s13 + $0x48] sm:$0xff]  }
 0x40c   :  { %2859 = vmatprep.mubr.bf16.mxu1 %v2167_v12  ;;  %2945 = vmatprep.mubr.bf16.mxu0 %v2167_v12  ;;  %v4208_v61 = vld [vmem:[%s5417_s11 + $0x230] ss:$12 sps:$4 sm:$0xff]   ;;  %v4210_v2 = vld [vmem:[%s5420_s13] sm:$0xff]   ;;  %v4212_v4 = vld [vmem:[%s5420_s13 + $0x8] sm:$0xff]  }
 0x40d   :  { %2860 = vmatmul.mubr.bf16.vlgmr.msra.gmra.mrb[36].mxu1 %v2166_v10  ;;  %2946 = vmatmul.mubr.bf16.vlgmr.msra.gmra.mrb[44].mxu0 %v2166_v10  ;;  %v4213_v33 = vld [vmem:[%s5420_s13 + $0x50] sm:$0xff]   ;;  %v4215_v5 = vld [vmem:[%s5420_s13 + $0x58] sm:$0xff]   ;;  %v4217_v8 = vld [vmem:[%s5420_s13 + $0x60] sm:$0xff]  }
 0x40e   :  { %2871 = vmatpush1.bf16.msra.mxu1 %v4145_v14  ;;  %2902 = vmatprep.mubr.bf16.mxu1 %v5174_v13  ;;  %v4214_v55 = vld [vmem:[%s5420_s13 + $0x10] sm:$0xff]   ;;  %v4216_v6 = vld [vmem:[%s5420_s13 + $0x18] sm:$0xff]   ;;  %v4218_v9 = vld [vmem:[%s5420_s13 + $0x20] sm:$0xff]  }
 0x40f   :  { %2872 = vmatprep.subr.bf16.mxu1 %v4150_v15  ;;  %3726 = vmatprep.subr.bf16.mxu0 %v4209_v0  ;;  %v4219_v10 = vld [vmem:[%s5420_s13 + $0x68] sm:$0xff]   ;;  %v4221_v12 = vld [vmem:[%s5420_s13 + $0x70] sm:$0xff]   ;;  %v4223_v14 = vld [vmem:[%s5420_s13 + $0x78] sm:$0xff]  }
 0x410   :  { %3727 = vmatpush3.bf16.msra.mxu0 %v4210_v2  ;;  %v4224_v15 = vld [vmem:[%s5420_s13 + $0x38] sm:$0xff]  }
 0x411   :  { %3728 = vmatprep.subr.bf16.mxu0 %v4211_v3 }
 0x412   :  { %2873 = vmatpush1.bf16.msra.mxu1 %v4148_v16  ;;  %v4225_v16 = vld [vmem:[%s5420_s13 + $0x80] sm:$0xff]  }
 0x413   :  { %2874 = vmatprep.subr.bf16.mxu1 %v4153_v17  ;;  %v4238_v17 = vmov 0.0  }
 0x414   :  { %3729 = vmatpush3.bf16.msra.mxu0 %v4212_v4 }
 0x415   :  { %3730 = vmatprep.subr.bf16.mxu0 %v4213_v33  ;;  %v3593_v33 = vld [vmem:[%s5422_s14] ss:$0 sm:$0xff] }
 0x416   :  { %2875 = vmatpush1.bf16.msra.mxu1 %v4151_v18  ;;  %v4226_v18 = vld [vmem:[%s5420_s13 + $0x88] sm:$0xff]  }
 0x417   :  { %2876 = vmatprep.subr.bf16.mxu1 %v4156_v19  ;;  %v4227_v19 = vld [vmem:[%s5420_s13 + $0x90] sm:$0xff]  }
 0x418   :  { %3731 = vmatpush3.bf16.msra.mxu0 %v4214_v55 }
 0x419   :  { %3732 = vmatprep.subr.bf16.mxu0 %v4215_v5 }
 0x41a   :  { %2877 = vmatpush1.bf16.msra.mxu1 %v4154_v20  ;;  %v4228_v20 = vld [vmem:[%s5420_s13 + $0x98] sm:$0xff]  }
 0x41b   :  { %2878 = vmatprep.subr.bf16.mxu1 %v4159_v21  ;;  %v4229_v21 = vld [vmem:[%s5420_s13 + $0xa0] sm:$0xff]  }
 0x41c   :  { %3733 = vmatpush3.bf16.msra.mxu0 %v4216_v6 }
 0x41d   :  { %3734 = vmatprep.subr.bf16.mxu0 %v4217_v8 }
 0x41e   :  { %2879 = vmatpush1.bf16.msra.mxu1 %v4157_v22  ;;  %v4230_v22 = vld [vmem:[%s5420_s13 + $0xa8] sm:$0xff]  }
 0x41f   :  { %2880 = vmatprep.subr.bf16.mxu1 %v4162_v23  ;;  %v4231_v23 = vld [vmem:[%s5420_s13 + $0xb0] sm:$0xff]  }
 0x420   :  { %3735 = vmatpush3.bf16.msra.mxu0 %v4218_v9 }
 0x421   :  { %3736 = vmatprep.subr.bf16.mxu0 %v4219_v10 }
 0x422   :  { %2881 = vmatpush1.bf16.msra.mxu1 %v4160_v24  ;;  %v4232_v24 = vld [vmem:[%s5420_s13 + $0xb8] sm:$0xff]  }
 0x423   :  { %2882 = vmatprep.subr.bf16.mxu1 %v4165_v25 }
 0x426   :  { %2883 = vmatpush1.bf16.msra.mxu1 %v4163_v26 }
 0x427   :  { %2884 = vmatprep.subr.bf16.mxu1 %v4168_v27 }
 0x42a   :  { %2885 = vmatpush1.bf16.msra.mxu1 %v4166_v7 }
 0x42b   :  { %2886 = vmatprep.subr.bf16.mxu1 %v4171_v28 }
 0x42e   :  { %2887 = vmatpush1.bf16.msra.mxu1 %v4169_v1 }
 0x42f   :  { %2888 = vmatprep.subr.bf16.mxu1 %v4174_v29  ;;  %v2298_v29 = vld [vmem:[%s5421_s12] sm:$0x7] }
 0x432   :  { %2889 = vmatpush1.bf16.msra.mxu1 %v4172_v30  ;;  %v2303_v30 = vrot.slane %v2298_v29, %v4420_v34  ;;  %v2311_v34 = vrot.slane %v2298_v29, %v4879_v54 }
 0x433   :  { %2890 = vmatprep.subr.bf16.mxu1 %v4177_v37  ;;  %v2307_v37 = vrot.slane %v2298_v29, %v4426_v36 }
 0x436   :  { %2891 = vmatpush1.bf16.msra.mxu1 %v4175_v31 }
 0x437   :  { %2892 = vmatprep.subr.bf16.mxu1 %v4180_v38 }
 0x43a   :  { %2893 = vmatpush1.bf16.msra.mxu1 %v4178_v32 }
 0x43b   :  { %2894 = vmatprep.subr.bf16.mxu1 %v4183_v35 }
 0x43e   :  { %2895 = vmatpush1.bf16.msra.mxu1 %v4181_v39 }
 0x43f   :  { %2896 = vmatprep.subr.bf16.mxu1 %v4186_v40 }
 0x442   :  { %2897 = vmatpush1.bf16.msra.mxu1 %v4184_v41 }
 0x443   :  { %2898 = vmatprep.subr.bf16.mxu1 %v4189_v42 }
 0x446   :  { %2899 = vmatpush1.bf16.msra.mxu1 %v4187_v43 }
 0x447   :  { %2900 = vmatprep.subr.bf16.mxu1 %v4192_v44 }
 0x44a   :  { %2901 = vmatpush1.bf16.msra.mxu1 %v4190_v45 }
 0x44b   :  { %3704 = vmatprep.subr.bf16.mxu1 %v4193_v46 }
 0x44d   :  { %2903 = vmatmul.mubr.bf16.vlgmr.msra.gmra.mrb[36].mxu1 %v5172_v11 }
 0x44e   :  { %3705 = vmatpush3.bf16.msra.mxu1 %v4194_v47  ;;  %2986 = vmatprep.mubr.bf16.mxu1 %v5174_v13  ;;  %v4222_v13 = vld [vmem:[%s5420_s13 + $0x30] sm:$0xff]  }
 0x44f   :  { %3706 = vmatprep.subr.bf16.mxu1 %v4195_v48 }
 0x452   :  { %3707 = vmatpush3.bf16.msra.mxu1 %v4196_v49 }
 0x453   :  { %3708 = vmatprep.subr.bf16.mxu1 %v4197_v50 }
 0x456   :  { %3709 = vmatpush3.bf16.msra.mxu1 %v4198_v51 }
 0x457   :  { %3710 = vmatprep.subr.bf16.mxu1 %v4199_v52 }
 0x45a   :  { %3711 = vmatpush3.bf16.msra.mxu1 %v4200_v53 }
 0x45b   :  { %3712 = vmatprep.subr.bf16.mxu1 %v4201_v56 }
 0x45e   :  { %3713 = vmatpush3.bf16.msra.mxu1 %v4202_v57 }
 0x45f   :  { %3714 = vmatprep.subr.bf16.mxu1 %v4203_v58 }
 0x462   :  { %3715 = vmatpush3.bf16.msra.mxu1 %v4204_v59 }
 0x463   :  { %3716 = vmatprep.subr.bf16.mxu1 %v4205_v60 }
 0x466   :  { %3717 = vmatpush3.bf16.msra.mxu1 %v4206_v62 }
 0x467   :  { %3718 = vmatprep.subr.bf16.mxu1 %v4207_v63 }
 0x46a   :  { %3719 = vmatpush3.bf16.msra.mxu1 %v4208_v61 }
 0x46b   :  { %3757 = vmatprep.subr.bf16.mxu1 %v4238_v17 }
 0x46d   :  { %2987 = vmatmul.mubr.bf16.vlgmr.msra.gmra.mrb[40].mxu1 %v5172_v11  ;;  %v4220_v11 = vld [vmem:[%s5420_s13 + $0x28] sm:$0xff]  }
 0x46e   :  { %3737 = vmatpush3.bf16.msra.mxu0 %v4220_v11  ;;  %3758 = vmatpush3.bf16.msra.mxu1 %v4225_v16 }
 0x46f   :  { %3738 = vmatprep.subr.bf16.mxu0 %v4221_v12  ;;  %3759 = vmatprep.subr.bf16.mxu1 %v4238_v17 }
 0x470   :  { %3773 = vmatprep.mubr.msk.bf16.mxu1 %vm4239_vm11, %v4238_v17 }
 0x472   :  { %3739 = vmatpush3.bf16.msra.mxu0 %v4222_v13  ;;  %3760 = vmatpush3.bf16.msra.mxu1 %v4226_v18 }
 0x473   :  { %3740 = vmatprep.subr.bf16.mxu0 %v4223_v14  ;;  %3761 = vmatprep.subr.bf16.mxu1 %v4238_v17 }
 0x476   :  { %3741 = vmatpush3.bf16.msra.mxu0 %v4224_v15  ;;  %3762 = vmatpush3.bf16.msra.mxu1 %v4227_v19 }
 0x477   :  { %3763 = vmatprep.subr.bf16.mxu1 %v4238_v17 }
 0x47a   :  { %3764 = vmatpush3.bf16.msra.mxu1 %v4228_v20 }
 0x47b   :  { %3765 = vmatprep.subr.bf16.mxu1 %v4238_v17 }
 0x47e   :  { %3766 = vmatpush3.bf16.msra.mxu1 %v4229_v21 }
 0x47f   :  { %3767 = vmatprep.subr.bf16.mxu1 %v4238_v17 }
 0x482   :  { %3768 = vmatpush3.bf16.msra.mxu1 %v4230_v22 }
 0x483   :  { %3769 = vmatprep.subr.bf16.mxu1 %v4238_v17 }
 0x486   :  { %3770 = vmatpush3.bf16.msra.mxu1 %v4231_v23 }
 0x487   :  { %3771 = vmatprep.subr.bf16.mxu1 %v4238_v17 }
 0x48a   :  { %3772 = vmatpush3.bf16.msra.mxu1 %v4232_v24 }
 0x4e0   :  { %v3698_v25 = vpop.f32.mrb[44].mxu0 }
 0x4e1   :  { %v3699_v26 = vpop.f32.mrb[45].mxu0 }
 0x4e2   :  { %v3700_v27 = vadd.f32 %v3699_v26, %v3698_v25  ;;  %v3701_v7 = vpop.f32.mrb[46].mxu0 }
 0x4e3   :  { %v3702_v28 = vpop.f32.mrb[47].mxu0 }
 0x4e4   :  { %v3703_v1 = vadd.f32 %v3702_v28, %v3701_v7  ;;  %v2948_v50 = vadd.f32 %v3700_v27, %v2311_v34 }
 0x4e6   :  { %v2951_v56 = vadd.f32 %v3703_v1, %v2311_v34 }
 0x520   :  { %v2904_v31 = vpop.f32.mrb[36].mxu1 }
 0x521   :  { %v3785_v38 = vadd.f32 %v2904_v31, %v2303_v30  ;;  %v2906_v32 = vpop.f32.mrb[37].mxu1 }
 0x522   :  { %v3786_v35 = vadd.f32 %v2906_v32, %v2307_v37  ;;  %v2908_v39 = vpop.f32.mrb[38].mxu1 }
 0x523   :  { %v3787_v40 = vadd.f32 %v2908_v39, %v2303_v30  ;;  %v2910_v41 = vpop.f32.mrb[39].mxu1  ;;  %v2995_v43 = vmax.f32 %v3785_v38, 0.0 }
 0x524   :  { %v3788_v42 = vadd.f32 %v2910_v41, %v2307_v37  ;;  %v2996_v45 = vmax.f32 %v3786_v35, 0.0 }
 0x525   :  { %v2998_v44 = vmax.f32 %v3787_v40, 0.0 }
 0x526   :  { %v2999_v46 = vmax.f32 %v3788_v42, 0.0 }
 0x527   :  { %v3001_v47 = vpack.c.bf16 %v2998_v44, %v2995_v43 }
 0x528   :  { %v3002_v48 = vpack.c.bf16 %v2999_v46, %v2996_v45 }
 0x52a   :  { %3235 = vmatprep.mubr.bf16.mxu0 %v3002_v48 }
 0x52b   :  { %3236 = vmatmul.mubr.bf16.vlgmr.msra.gmra.mrb[48].mxu0 %v3001_v47 }
 0x540   :  { %v3720_v49 = vpop.f32.mrb[40].mxu1 }
 0x541   :  { %v3721_v36 = vpop.f32.mrb[41].mxu1 }
 0x542   :  { %v3722_v51 = vadd.f32 %v3721_v36, %v3720_v49  ;;  %v3723_v52 = vpop.f32.mrb[42].mxu1 }
 0x543   :  { %v3724_v53 = vpop.f32.mrb[43].mxu1 }
 0x544   :  { %v2989_v57 = vadd.f32 %v3722_v51, %v2948_v50  ;;  %v3725_v58 = vadd.f32 %v3724_v53, %v3723_v52 }
 0x546   :  { %v2992_v59 = vadd.f32 %v3725_v58, %v2951_v56  ;;  %v2997_v60 = vmax.f32 %v2989_v57, 0.0 }
 0x548   :  { %v3000_v62 = vmax.f32 %v2992_v59, 0.0 }
 0x54a   :  { %v3003_v63 = vpack.c.bf16 %v3000_v62, %v2997_v60 }
 0x54c   :  { %3774 = vmatmul.mubr.bf16.vlgmr.msra.gmra.mrb[44].mxu1 %v3003_v63 }
 0x5fe   :  { %v3742_v61 = vpop.f32.mrb[48].mxu0 }
 0x5ff   :  { %v3743_v0 = vpop.f32.mrb[49].mxu0 }
 0x600   :  { %v3744_v2 = vadd.f32 %v3743_v0, %v3742_v61  ;;  %v3745_v3 = vpop.f32.mrb[50].mxu0 }
 0x601   :  { %v3746_v4 = vpop.f32.mrb[51].mxu0 }
 0x602   :  { %v3747_v54 = vadd.f32 %v3746_v4, %v3745_v3  ;;  %v3238_v55 = vadd.f32 %v3744_v2, %v3593_v33 }
 0x604   :  { %v3241_v9 = vadd.f32 %v3747_v54, %v3593_v33 }
 0x61f   :  { %v3278_v5 = vpop.f32.mrb[44].mxu1 }
 0x620   :  { %v3279_v6 = vadd.f32 %v3278_v5, %v3238_v55  ;;  %v3775_v8 = vpop.f32.mrb[45].mxu1 }
 0x621   :  { %v3281_v10 = vpop.f32.mrb[46].mxu1 }
 0x622   :  { %4233 = vtanh.f32 %v3279_v6  ;;  %v3282_v11 = vadd.f32 %v3281_v10, %v3241_v9  ;;  %v3776_v12 = vpop.f32.mrb[47].mxu1 }
 0x624   :  { %4235 = vtanh.f32 %v3282_v11 }
 0x62c   :  { %v4234_v13 = vpop.eup %4233 }
 0x62d   :  { %3287 = vst [vmem:[%s5423_s15] sm:$0xff] %v4234_v13 }
 0x62e   :  { %v4236_v14 = vpop.eup %4235 }
 0x62f   :  { %3288 = vst [vmem:[%s5423_s15 + $0x8] sm:$0xff] %v4236_v14 }

</bundles_post_ra>
